<compile_context>
chip_gen: v7x
topology: tpu7x:2x2x1
jax: 0.10.0
libtpu: 0.0.40
codegen_flags: <defaults>
</compile_context>

<pallas_src>
import jax
import jax.numpy as jnp
from jax.experimental import pallas as pl
from jax.experimental.pallas import tpu as pltpu


HIDDEN = 256
IN_DIM = 3
OUT_DIM = 3


def _cdiv(a, b):
    return (a + b - 1) // b


def _round_up(x, m):
    return ((x + m - 1) // m) * m


def actor_kernel(xt_ref, w1t_ref, w23t_ref, w4t_ref, b_ref, out_ref):
    xt = xt_ref[...]          # (3, TM)   f32  (batch on lanes)
    w1t = w1t_ref[...]        # (256, 3)  f32

    # fc1 (K=3): 3 VPU broadcast FMAs instead of a zero-padded MXU matmul.
    # xt rows broadcast over sublanes (stride-0), w1t columns broadcast over lanes.
    h = (w1t[:, 0:1] * xt[0:1, :]
         + w1t[:, 1:2] * xt[1:2, :]
         + w1t[:, 2:3] * xt[2:3, :]
         + b_ref[:, 0:1])
    h = jnp.maximum(h, 0.0)                                     # (256, TM) f32

    # fc2 + ReLU  (bf16 MXU operands, f32 accumulate & elementwise)
    h = jnp.dot(w23t_ref[0], h.astype(jnp.bfloat16),
                preferred_element_type=jnp.float32)
    h = jnp.maximum(h + b_ref[:, 1:2], 0.0)

    # fc3 + ReLU
    h = jnp.dot(w23t_ref[1], h.astype(jnp.bfloat16),
                preferred_element_type=jnp.float32)
    h = jnp.maximum(h + b_ref[:, 2:3], 0.0)

    # action_out + sigmoid
    logits = jnp.dot(w4t_ref[...], h.astype(jnp.bfloat16),
                     preferred_element_type=jnp.float32)        # (3, TM)
    logits = logits + b_ref[0:OUT_DIM, 3:4]
    out_ref[...] = jax.nn.sigmoid(logits)


def actor_forward(x, kparams, *, tm=2048):
    """x: [B, 3] f32 -> actions: [B, 3] f32 in (0, 1)."""
    w1t, w23t, w4t, b = kparams
    B = x.shape[0]

    # Tile selection (batch is the lane axis -> multiples of 128/256):
    #  - small batches: one lane-aligned tile.
    #  - large batches: TM <= tm (multiple of 256), grid forced to an even
    #    number of steps (>=2) so v7x's two TensorCores split the work.
    if B <= 256:
        tm_eff = _round_up(max(B, 1), 128)
        b_pad = tm_eff
    else:
        tm_eff = min(tm, _round_up(_cdiv(B, 2), 256))
        b_pad = _round_up(B, 2 * tm_eff)
    grid = (b_pad // tm_eff,)

    xt = x.T                                   # (3, B) lane-dense layout
    if b_pad != B:
        xt = jnp.pad(xt, ((0, 0), (0, b_pad - B)))

    flops = b_pad * 2 * (IN_DIM * HIDDEN + 2 * HIDDEN * HIDDEN + HIDDEN * OUT_DIM)
    bytes_accessed = (b_pad * (IN_DIM + OUT_DIM) * 4
                      + w1t.size * 4 + w23t.size * 2 + w4t.size * 2 + b.size * 4)

    out_t = pl.pallas_call(
        actor_kernel,
        out_shape=jax.ShapeDtypeStruct((OUT_DIM, b_pad), jnp.float32),
        grid=grid,
        in_specs=[
            # Activations: tiled over the batch (lane) axis.
            pl.BlockSpec((IN_DIM, tm_eff), lambda i: (0, i)),
            # Weights / biases: constant index_map -> fetched once, VMEM-resident.
            pl.BlockSpec((HIDDEN, IN_DIM), lambda i: (0, 0)),
            pl.BlockSpec((2, HIDDEN, HIDDEN), lambda i: (0, 0, 0)),
            pl.BlockSpec((OUT_DIM, HIDDEN), lambda i: (0, 0)),
            pl.BlockSpec((HIDDEN, 4), lambda i: (0, 0)),
        ],
        out_specs=pl.BlockSpec((OUT_DIM, tm_eff), lambda i: (0, i)),
        compiler_params=pltpu.CompilerParams(
            dimension_semantics=("parallel",),
            vmem_limit_bytes=32 * 1024 * 1024),
        cost_estimate=pl.CostEstimate(
            flops=flops,
            transcendentals=b_pad * OUT_DIM,
            bytes_accessed=bytes_accessed),
    )(xt, w1t, w23t, w4t, b)

    return out_t[:, :B].T


def init_params(key):
    """Deterministic f32 master params matching the nn.Linear shapes of `actor`."""
    ks = jax.random.split(key, 8)

    def linear(kw, kb, fan_in, fan_out):
        # PyTorch default: U(-1/sqrt(fan_in), 1/sqrt(fan_in))
        bound = 1.0 / jnp.sqrt(float(fan_in))
        w = jax.random.uniform(kw, (fan_in, fan_out), jnp.float32, -bound, bound)
        b = jax.random.uniform(kb, (1, fan_out), jnp.float32, -bound, bound)
        return w, b

    w1, b1 = linear(ks[0], ks[1], IN_DIM, HIDDEN)
    w2, b2 = linear(ks[2], ks[3], HIDDEN, HIDDEN)
    w3, b3 = linear(ks[4], ks[5], HIDDEN, HIDDEN)
    w4, b4 = linear(ks[6], ks[7], HIDDEN, OUT_DIM)
    return (w1, b1, w2, b2, w3, b3, w4, b4)


def pack_params(params):
    """Kernel operand layout: transposed weights (h^T = W^T h^T), bf16 MXU weights,
    biases stacked as (256, 4) columns (b4 zero-padded)."""
    (w1, b1, w2, b2, w3, b3, w4, b4) = params
    w1t = w1.T                                                  # (256, 3)      f32 (VPU path)
    w23t = jnp.stack([w2.T, w3.T]).astype(jnp.bfloat16)         # (2, 256, 256) bf16
    w4t = w4.T.astype(jnp.bfloat16)                             # (3, 256)      bf16
    b4p = jnp.pad(b4, ((0, 0), (0, HIDDEN - OUT_DIM)))          # (1, 256) zero-padded
    b = jnp.concatenate([b1, b2, b3, b4p], axis=0).T            # (256, 4)      f32
    return (w1t, w23t, w4t, b)


def reference_forward(x, params):
    (w1, b1, w2, b2, w3, b3, w4, b4) = params
    h = jnp.maximum(x @ w1 + b1, 0.0)
    h = jnp.maximum(h @ w2 + b2, 0.0)
    h = jnp.maximum(h @ w3 + b3, 0.0)
    return jax.nn.sigmoid(h @ w4 + b4)


if __name__ == "__main__":
    key = jax.random.PRNGKey(0)
    k_params, k_x1, k_x2 = jax.random.split(key, 3)
    params = init_params(k_params)     # f32 master weights
    kparams = pack_params(params)      # kernel layout (transposed, bf16 matmul weights)

    # Main check: batch big enough to exercise the batch grid (grid=(2,)).
    B = 512
    x = jax.random.normal(k_x1, (B, 3), jnp.float32)
    actions = jax.block_until_ready(actor_forward(x, kparams))
    ref = reference_forward(x, params)
    assert actions.shape == (B, OUT_DIM)
    # bf16 matmul operands -> relaxed tolerance vs. pure-f32 reference.
    max_err = float(jnp.max(jnp.abs(actions - ref)))
    assert max_err < 2e-2, f"mismatch vs reference: max abs err {max_err}"

    # Secondary check: small, non-tile-aligned batch (exercises padding path).
    B2 = 20
    x2 = jax.random.normal(k_x2, (B2, 3), jnp.float32)
    actions2 = jax.block_until_ready(actor_forward(x2, kparams))
    ref2 = reference_forward(x2, params)
    assert actions2.shape == (B2, OUT_DIM)
    max_err2 = float(jnp.max(jnp.abs(actions2 - ref2)))
    assert max_err2 < 2e-2, f"small-batch mismatch: max abs err {max_err2}"

    print("KERNEL_OK")
</pallas_src>

<mosaic_0001>
module attributes {stable_mosaic.version = 11 : i64} {
  func.func @actor_kernel(%arg0: i32, %arg1: memref<3x256xf32, #tpu.memory_space<vmem>>, %arg2: memref<256x3xf32, #tpu.memory_space<vmem>>, %arg3: memref<2x256x256xbf16, #tpu.memory_space<vmem>>, %arg4: memref<3x256xbf16, #tpu.memory_space<vmem>>, %arg5: memref<256x4xf32, #tpu.memory_space<vmem>>, %arg6: memref<3x256xf32, #tpu.memory_space<vmem>>) attributes {dimension_semantics = [#tpu.dimension_semantics<parallel>], iteration_bounds = array<i64: 2>, scalar_prefetch = 0 : i64, scratch_operands = 0 : i64, tpu.core_type = #tpu.core_type<tc>, window_params = [{transform_indices = @transform_0, window_bounds = array<i64: 3, 256>}, {pipeline_mode = #tpu.pipeline_mode<synchronous>, transform_indices = @transform_1, window_bounds = array<i64: 256, 3>}, {pipeline_mode = #tpu.pipeline_mode<synchronous>, transform_indices = @transform_2, window_bounds = array<i64: 2, 256, 256>}, {pipeline_mode = #tpu.pipeline_mode<synchronous>, transform_indices = @transform_3, window_bounds = array<i64: 3, 256>}, {pipeline_mode = #tpu.pipeline_mode<synchronous>, transform_indices = @transform_4, window_bounds = array<i64: 256, 4>}, {transform_indices = @transform_5, window_bounds = array<i64: 3, 256>}]} {
    %c0 = arith.constant 0 : index
    %c0_0 = arith.constant 0 : index
    %0 = vector.load %arg1[%c0, %c0_0] : memref<3x256xf32, #tpu.memory_space<vmem>>, vector<3x256xf32>
    %c0_1 = arith.constant 0 : index
    %c0_2 = arith.constant 0 : index
    %1 = vector.load %arg2[%c0_1, %c0_2] : memref<256x3xf32, #tpu.memory_space<vmem>>, vector<256x3xf32>
    %2 = vector.extract_strided_slice %1 {offsets = [0, 0], sizes = [256, 1], strides = [1, 1]} : vector<256x3xf32> to vector<256x1xf32>
    %3 = vector.extract_strided_slice %0 {offsets = [0, 0], sizes = [1, 256], strides = [1, 1]} : vector<3x256xf32> to vector<1x256xf32>
    %4 = vector.broadcast %2 : vector<256x1xf32> to vector<256x256xf32>
    %5 = vector.broadcast %3 : vector<1x256xf32> to vector<256x256xf32>
    %6 = arith.mulf %4, %5 : vector<256x256xf32>
    %7 = vector.extract_strided_slice %1 {offsets = [0, 1], sizes = [256, 1], strides = [1, 1]} : vector<256x3xf32> to vector<256x1xf32>
    %8 = vector.extract_strided_slice %0 {offsets = [1, 0], sizes = [1, 256], strides = [1, 1]} : vector<3x256xf32> to vector<1x256xf32>
    %9 = vector.broadcast %7 : vector<256x1xf32> to vector<256x256xf32>
    %10 = vector.broadcast %8 : vector<1x256xf32> to vector<256x256xf32>
    %11 = arith.mulf %9, %10 : vector<256x256xf32>
    %12 = arith.addf %6, %11 : vector<256x256xf32>
    %13 = vector.extract_strided_slice %1 {offsets = [0, 2], sizes = [256, 1], strides = [1, 1]} : vector<256x3xf32> to vector<256x1xf32>
    %14 = vector.extract_strided_slice %0 {offsets = [2, 0], sizes = [1, 256], strides = [1, 1]} : vector<3x256xf32> to vector<1x256xf32>
    %15 = vector.broadcast %13 : vector<256x1xf32> to vector<256x256xf32>
    %16 = vector.broadcast %14 : vector<1x256xf32> to vector<256x256xf32>
    %17 = arith.mulf %15, %16 : vector<256x256xf32>
    %18 = arith.addf %12, %17 : vector<256x256xf32>
    %c0_3 = arith.constant 0 : index
    %c0_4 = arith.constant 0 : index
    %19 = vector.load %arg5[%c0_3, %c0_4] : memref<256x4xf32, #tpu.memory_space<vmem>>, vector<256x1xf32>
    %20 = vector.broadcast %19 : vector<256x1xf32> to vector<256x256xf32>
    %21 = arith.addf %18, %20 : vector<256x256xf32>
    %cst = arith.constant 0.000000e+00 : f32
    %22 = vector.broadcast %cst : f32 to vector<256x256xf32>
    %23 = arith.maximumf %21, %22 : vector<256x256xf32>
    %c0_5 = arith.constant 0 : index
    %c0_6 = arith.constant 0 : index
    %c0_7 = arith.constant 0 : index
    %24 = vector.load %arg3[%c0_5, %c0_6, %c0_7] : memref<2x256x256xbf16, #tpu.memory_space<vmem>>, vector<1x256x256xbf16>
    %25 = vector.shape_cast %24 : vector<1x256x256xbf16> to vector<256x256xbf16>
    %26 = arith.truncf %23 : vector<256x256xf32> to vector<256x256xbf16>
    %cst_8 = arith.constant dense<0.000000e+00> : vector<256x256xf32>
    %27 = tpu.matmul %25, %26, %cst_8 {dimension_numbers = #tpu.dot_dimension_numbers<[1], [0], [0], [1], [0, 0, 1, 1], [], []>} : vector<256x256xbf16>, vector<256x256xbf16>, vector<256x256xf32> -> vector<256x256xf32>
    %c0_9 = arith.constant 0 : index
    %c1 = arith.constant 1 : index
    %28 = vector.load %arg5[%c0_9, %c1] : memref<256x4xf32, #tpu.memory_space<vmem>>, vector<256x1xf32>
    %29 = vector.broadcast %28 : vector<256x1xf32> to vector<256x256xf32>
    %30 = arith.addf %27, %29 : vector<256x256xf32>
    %cst_10 = arith.constant 0.000000e+00 : f32
    %31 = vector.broadcast %cst_10 : f32 to vector<256x256xf32>
    %32 = arith.maximumf %30, %31 : vector<256x256xf32>
    %c1_11 = arith.constant 1 : index
    %c0_12 = arith.constant 0 : index
    %c0_13 = arith.constant 0 : index
    %33 = vector.load %arg3[%c1_11, %c0_12, %c0_13] : memref<2x256x256xbf16, #tpu.memory_space<vmem>>, vector<1x256x256xbf16>
    %34 = vector.shape_cast %33 : vector<1x256x256xbf16> to vector<256x256xbf16>
    %35 = arith.truncf %32 : vector<256x256xf32> to vector<256x256xbf16>
    %cst_14 = arith.constant dense<0.000000e+00> : vector<256x256xf32>
    %36 = tpu.matmul %34, %35, %cst_14 {dimension_numbers = #tpu.dot_dimension_numbers<[1], [0], [0], [1], [0, 0, 1, 1], [], []>} : vector<256x256xbf16>, vector<256x256xbf16>, vector<256x256xf32> -> vector<256x256xf32>
    %c0_15 = arith.constant 0 : index
    %c2 = arith.constant 2 : index
    %37 = vector.load %arg5[%c0_15, %c2] : memref<256x4xf32, #tpu.memory_space<vmem>>, vector<256x1xf32>
    %38 = vector.broadcast %37 : vector<256x1xf32> to vector<256x256xf32>
    %39 = arith.addf %36, %38 : vector<256x256xf32>
    %cst_16 = arith.constant 0.000000e+00 : f32
    %40 = vector.broadcast %cst_16 : f32 to vector<256x256xf32>
    %41 = arith.maximumf %39, %40 : vector<256x256xf32>
    %c0_17 = arith.constant 0 : index
    %c0_18 = arith.constant 0 : index
    %42 = vector.load %arg4[%c0_17, %c0_18] : memref<3x256xbf16, #tpu.memory_space<vmem>>, vector<3x256xbf16>
    %43 = arith.truncf %41 : vector<256x256xf32> to vector<256x256xbf16>
    %cst_19 = arith.constant dense<0.000000e+00> : vector<3x256xf32>
    %44 = tpu.matmul %42, %43, %cst_19 {dimension_numbers = #tpu.dot_dimension_numbers<[1], [0], [0], [1], [0, 0, 1, 1], [], []>} : vector<3x256xbf16>, vector<256x256xbf16>, vector<3x256xf32> -> vector<3x256xf32>
    %c0_20 = arith.constant 0 : index
    %c3 = arith.constant 3 : index
    %45 = vector.load %arg5[%c0_20, %c3] : memref<256x4xf32, #tpu.memory_space<vmem>>, vector<3x1xf32>
    %46 = vector.broadcast %45 : vector<3x1xf32> to vector<3x256xf32>
    %47 = arith.addf %44, %46 : vector<3x256xf32>
    %48 = arith.negf %47 : vector<3x256xf32>
    %49 = math.exp %48 : vector<3x256xf32>
    %cst_21 = arith.constant 1.000000e+00 : f32
    %50 = vector.broadcast %cst_21 : f32 to vector<3x256xf32>
    %51 = arith.addf %50, %49 : vector<3x256xf32>
    %52 = arith.divf %50, %51 : vector<3x256xf32>
    %c0_22 = arith.constant 0 : index
    %c0_23 = arith.constant 0 : index
    %53 = vector.load %arg6[%c0_22, %c0_23] : memref<3x256xf32, #tpu.memory_space<vmem>>, vector<3x256xf32>
    tpu.vector_store %arg6[%c0_22, %c0_23], %52 {strides = array<i32>} : memref<3x256xf32, #tpu.memory_space<vmem>>, vector<3x256xf32>,
    return
  }
  func.func @transform_0(%arg0: i32) -> (i32, i32) {
    %c0_i32 = arith.constant 0 : i32
    %c0_i32_0 = arith.constant 0 : i32
    return %c0_i32, %arg0 : i32, i32
  }
  func.func @transform_1(%arg0: i32) -> (i32, i32) {
    %c0_i32 = arith.constant 0 : i32
    %c0_i32_0 = arith.constant 0 : i32
    %c0_i32_1 = arith.constant 0 : i32
    return %c0_i32, %c0_i32_0 : i32, i32
  }
  func.func @transform_2(%arg0: i32) -> (i32, i32, i32) {
    %c0_i32 = arith.constant 0 : i32
    %c0_i32_0 = arith.constant 0 : i32
    %c0_i32_1 = arith.constant 0 : i32
    %c0_i32_2 = arith.constant 0 : i32
    return %c0_i32, %c0_i32_0, %c0_i32_1 : i32, i32, i32
  }
  func.func @transform_3(%arg0: i32) -> (i32, i32) {
    %c0_i32 = arith.constant 0 : i32
    %c0_i32_0 = arith.constant 0 : i32
    %c0_i32_1 = arith.constant 0 : i32
    return %c0_i32, %c0_i32_0 : i32, i32
  }
  func.func @transform_4(%arg0: i32) -> (i32, i32) {
    %c0_i32 = arith.constant 0 : i32
    %c0_i32_0 = arith.constant 0 : i32
    %c0_i32_1 = arith.constant 0 : i32
    return %c0_i32, %c0_i32_0 : i32, i32
  }
  func.func @transform_5(%arg0: i32) -> (i32, i32) {
    %c0_i32 = arith.constant 0 : i32
    %c0_i32_0 = arith.constant 0 : i32
    return %c0_i32, %arg0 : i32, i32
  }
}

</mosaic_0001>

<bundles_post_ra>
// kernel: tpu_custom_call.1
= control target key start
LH: loop header
LB: loop body
LE: loop exit
PB: predicated region body
PF: predicated region fallthrough
CT: control target
= control target key end

     0   :  { %10 = vsyncpa [#allocation3], 0  ;;  %s4550_s0 = inlined_call_operand.vmem [shape: f32[3,512], index: 0, kind: input, shape index: {}]   ;;  %s4551_s1 = inlined_call_operand.vmem [shape: f32[256,3], index: 1, kind: input, shape index: {}]   ;;  %s4552_s2 = inlined_call_operand.vmem [shape: bf16[2,256,256], index: 2, kind: input, shape index: {}]   ;;  %s4553_s3 = inlined_call_operand.hbm [shape: bf16[3,256], index: 3, kind: input, shape index: {}]   ;;  %s4554_s4 = inlined_call_operand.vmem [shape: f32[256,4], index: 4, kind: input, shape index: {}]   ;;  %s4555_s5 = inlined_call_operand.hbm [shape: f32[3,512], index: 5, kind: output, shape index: {}]  }
   0x1   :  { %11 = vsyncpa [#allocation4], 0 }
   0x2   :  { %13 = vsyncpa [#allocation4 + $0x1], 0  ;;  %s3285_s18 = smov 0   ;;  %s3287_s19 = smov 0  }
   0x3   :  { %s3289_s20 = smov 0   ;;  %s3291_s21 = smov 0  }
   0x4 LB: > { %s3306_s22 = sadd.s32 4294967295, %s3247_s21   ;;  %s2796_s23 = sadd.s32 4294967294, %s3247_s21   ;;  %s3247_s21 = sphi %s3291_s21, %s4667_s21   ;;  %s3243_s20 = sphi %s3289_s20, %s4666_s20   ;;  %s3239_s19 = sphi %s3287_s19, %s4665_s19   ;;  %s3235_s18 = sphi %s3285_s18, %s4664_s18  }
   0x5   : > { %s3310_s24 = sadd.s32 1, %s3247_s21   ;;  %s136_s25 = sadd.s32 1, %s3243_s20 }
   0x6   : > { %s133_s26 = ssub.s32 %s3247_s21, %s3310_s24  ;;  %p146_p0 = scmp.ne.s32.totalorder %s3243_s20, %s3239_s19 }
   0x7   : > { %p134_p1 = scmp.eq.s32.totalorder %s133_s26, 0  ;;  %p147_p2 = scmp.eq.s32.totalorder %s3306_s22, 1 }
   0x8   : > { %p152_p3 = scmp.ne.s32.totalorder %s3239_s19, %s3235_s18  ;;  %p153_p4 = scmp.eq.s32.totalorder %s2796_s23, 1 }
   0x9   : > { %s3321_s27 = scalar_select %p134_p1, %s3243_s20, %s136_s25  }
   0xa   : > { %p3323_p5 = por %p147_p2, %p146_p0  ;;  %p3327_p6 = por %p153_p4, %p152_p3 }
   0xb   : > { %p2797_p7 = scmp.ge.s32.totalorder %s3247_s21, 1  ;;  %p160_p8 = scmp.lt.s32.totalorder %s3247_s21, 3 }
   0xc   : > { %s4594_s28 = scalar_select %p3323_p5, 1, 0 }
   0xd   : > { %s4595_s29 = scalar_select %p3327_p6, 1, 0 }
   0xe   : > { %p4556_p9 = scmp.eq.s32.totalorder %s3306_s22, 0  ;;  %p3334_p10 = pnand %p2797_p7, %p160_p8 }
   0xf   : > { %s3249_s6 = smov [#allocation2]   ;;  %s3153_s11 = scalar_lea.hbm %s4553_s3, 64 }
  0x10   : > { %s4596_s30 = scalar_select %p3334_p10, 1, 0 }
  0x11   : > { %s179_s7 = sshll.u32 %s3249_s6, 4  ;;  %p2916_p11 = pneg %p3334_p10  ;;  %s180_s7 = int_to_ptr.vmem [resolvable:$true] %s179_s7 }
  0x12   : > { %p3154_p13 = scmp.ne.s32.totalorder %s4553_s3, %s3153_s11  ;;  %p3160_p3 = scmp.lt.u32.totalorder %s3153_s11, %s4553_s3 }
  0x13   : > { %p3342_p12 = pnand %p4556_p9, %p2916_p11 }
  0x15   : > { %p3155_p0 = pneg %p3342_p12 }
  0x17   : > { %p3156_p1 = pnand %p3155_p0, %p3154_p13 }
  0x19   : > { %p3157_p2 = pneg %p3156_p1 }
  0x1b   : > { %p3162_p4 = pnand %p3160_p3, %p3157_p2 }
  0x1d   : > { %3165 = shalt.err (!%p3162_p4)
}
  0x1e   : > { %s3166_s16 = scalar_lea.vmem %s180_s7, 64  ;;  %p3174_p9 = scmp.lt.s32.totalorder %s180_s7, %s180_s7 }
  0x1f   : > { %p3167_p7 = scmp.ne.s32.totalorder %s180_s7, %s3166_s16  ;;  %p3175_p6 = scmp.lt.s32.totalorder %s3166_s16, %s3166_s16 }
  0x21   : > { %p3169_p8 = pnand %p3167_p7, %p3155_p0  ;;  %p3176_p5 = por %p3175_p6, %p3174_p9 }
  0x23   : > { %p3170_p11 = pneg %p3169_p8 }
  0x25   : > { %p3177_p10 = pnand %p3176_p5, %p3170_p11 }
  0x27   : > { %3180 = shalt.err (!%p3177_p10)
}
  0x28   : > { %2919 = dma.hbm_to_vmem [thread:$0]  (!%p3342_p12), %s4553_s3, 64, %s180_s7, [#allocation3]  }
  0x29   : > { %p4598_p13 = scmp.ne.s32.totalorder %s4596_s30, 0 }
  0x2b   : > { %204 = sbr.rel (%p4598_p13) target bundleno = 1503 (0x5df), region = 40 }
  0x32   : > { %p4599_p1 = scmp.eq.s32.totalorder %s3306_s22, 0 }
  0x34   : > { %3226 = dma.done.wait (%p4599_p1), [#allocation3], 64   ;;  %p4600_p0 = pmov %p4599_p1 }
  0x35   : > { %v4561_v0 = vmov 2   ;;  %v4563_v1 = vmov 1   ;;  %v3373_v2 = vld [vmem:[%s4551_s1] sm:$0xff]  ;;  %v242_v3 = vld [vmem:[%s4551_s1 + $0x10] sm:$0xff]  ;;  %v3383_v4 = vld [vmem:[%s4551_s1 + $0x8] sm:$0xff]  ;;  %v4559_v7 = vmov 0  }
  0x36   : > { %3228 = vsyncadd (%p4600_p0), [#allocation3], 4294967232  ;;  %2965 = vset.pattern.permute.xlu0 %v4561_v0  ;;  %2964 = vset.pattern.permute.xlu1 %v4563_v1  ;;  %v245_v5 = vld [vmem:[%s4551_s1 + $0x28] sm:$0xff]  ;;  %v244_v6 = vld [vmem:[%s4551_s1 + $0x20] sm:$0xff]  ;;  %s2803_s9 = sshll.u32 %s3306_s22, 1  ;;  %s229_s23 = sand.u32 1, %s3239_s19  }
  0x37   : > { %790 = vperm.xlu0 %2965, %v3373_v2   ;;  %516 = vperm.xlu1 %2964, %v3373_v2   ;;  %v247_v8 = vld [vmem:[%s4551_s1 + $0x38] sm:$0xff]  ;;  %v3402_v9 = vld [vmem:[%s4551_s1 + $0x48] sm:$0xff]  ;;  %v3430_v14 = vld [vmem:[%s4554_s4] sm:$0xff]  ;;  %p233_p5 = scmp.lt.s32.totalorder %s2803_s9, 3  ;;  %s2909_s26 = sshll.u32 %s3306_s22, 7 }
  0x38   : > { %v243_v10 = vld [vmem:[%s4551_s1 + $0x18] sm:$0xff]  ;;  %v3417_v12 = vld [vmem:[%s4551_s1 + $0x68] sm:$0xff]  ;;  %4601 = vst [vmem:[#allocation8_spill] sm:$0xff] %v3430_v14  ;;  %v1065_v20 = vld [vmem:[%s4554_s4 + $0x10] sm:$0xff]  ;;  %s2711_s10 = scalar_lea.sflag [#allocation4], %s229_s23  ;;  %p4662_p9 = scmp.ne.s32.totalorder %s4594_s28, 0 }
  0x39   : > { %v3412_v11 = vld [vmem:[%s4551_s1 + $0x58] sm:$0xff]  ;;  %v3438_v15 = vld [vmem:[%s4551_s1 + $0x88] sm:$0xff]  ;;  %v246_v25 = vld [vmem:[%s4551_s1 + $0x30] sm:$0xff]  ;;  %s4669_s9 = smov (!%p233_p5, %s2803_s9), 3  ;;  %s3254_s22 = smov [#allocation5]  }
  0x3a   : > { %v3424_v13 = vld [vmem:[%s4551_s1 + $0x78] sm:$0xff]  ;;  %v3450_v17 = vld [vmem:[%s4551_s1 + $0xa8] sm:$0xff]  ;;  %v248_v28 = vld [vmem:[%s4551_s1 + $0x40] sm:$0xff]  ;;  %s2804_s16 = sshll.u32 %s4669_s9, 2  ;;  %s4508_s9 = scalar_lea.hbm %s4555_s5, %s2909_s26 }
  0x3b   : > { %798 = vperm.xlu0 %2965, %v242_v3   ;;  %520 = vperm.xlu1 %2964, %v3383_v4   ;;  %v3444_v16 = vld [vmem:[%s4551_s1 + $0x98] sm:$0xff]  ;;  %4602 = vst [vmem:[#allocation9_spill] sm:$0xff] %v3450_v17  ;;  %v3464_v19 = vld [vmem:[%s4551_s1 + $0xc8] sm:$0xff]  ;;  %v3522_v29 = vld [vmem:[%s4554_s4 + $0x20] sm:$0xff]  ;;  %s236_s25 = scalar_lea.vmem %s4550_s0, %s2804_s16  ;;  %s3185_s12 = sshll.u32 %s3254_s22, 4  ;;  %s3186_s12 = int_to_ptr.vmem [resolvable:$false] %s3185_s12 }
  0x3c   : > { %v3457_v18 = vld [vmem:[%s4551_s1 + $0xb8] sm:$0xff]  ;;  %4604 = vst [vmem:[#allocation11_spill] sm:$0xff] %v3464_v19  ;;  %v3485_v23 = vld [vmem:[%s4551_s1 + $0xe8] sm:$0xff]  ;;  %v3530_v30 = vld [vmem:[%s4554_s4 + $0x30] sm:$0xff]  ;;  %s3187_s13 = scalar_lea.vmem %s3186_s12, 256 }
  0x3d   : > { %4603 = vst [vmem:[#allocation10_spill] sm:$0xff] %v3457_v18  ;;  %v3473_v21 = vld [vmem:[%s4551_s1 + $0xd8] sm:$0xff]  ;;  %v3506_v26 = vld [vmem:[%s4554_s4 + $0x8] sm:$0xff]  ;;  %v3539_v31 = vld [vmem:[%s4554_s4 + $0x40] sm:$0xff] }
  0x3e   : > { %v3480_v22 = vld [vmem:[%s4554_s4 + $0x18] sm:$0xff]  ;;  %v3511_v27 = vld [vmem:[%s4554_s4 + $0x28] sm:$0xff]  ;;  %v250_v33 = vld [vmem:[%s4551_s1 + $0x50] sm:$0xff] }
  0x3f   : > { %810 = vperm.xlu0 %2965, %v245_v5   ;;  %2966 = vset.pattern.permute.xlu1 %v4561_v0  ;;  %4605 = vst [vmem:[#allocation12_spill] sm:$0xff] %v3480_v22  ;;  %v3492_v24 = vld [vmem:[%s4551_s1 + $0xf8] sm:$0xff]  ;;  %4606 = vst [vmem:[#allocation13_spill] sm:$0xff] %v3511_v27  ;;  %v3556_v34 = vld [vmem:[%s4554_s4 + $0x50] sm:$0xff] }
  0x40   : > { %794 = vperm.xlu1 %2966, %v3383_v4   ;;  %v3544_v32 = vld [vmem:[%s4554_s4 + $0x38] sm:$0xff]  ;;  %v3565_v35 = vld [vmem:[%s4554_s4 + $0x60] sm:$0xff]  ;;  %v3572_v36 = vld [vmem:[%s4554_s4 + $0x48] sm:$0xff] }
  0x41   : > { %4607 = vst [vmem:[#allocation14_spill] sm:$0xff] %v3544_v32  ;;  %4608 = vst [vmem:[#allocation15_spill] sm:$0xff] %v3572_v36  ;;  %v3582_v39 = vld [vmem:[%s4554_s4 + $0x70] sm:$0xff]  ;;  %v252_v40 = vld [vmem:[%s4551_s1 + $0x60] sm:$0xff] }
  0x42   : > { %v3600_v44 = vld [vmem:[%s4554_s4 + $0x80] sm:$0xff]  ;;  %v3615_v48 = vld [vmem:[%s4554_s4 + $0x90] sm:$0xff]  ;;  %v3628_v52 = vld [vmem:[%s4554_s4 + $0x58] sm:$0xff] }
  0x43   : > { %2973 = vset.pattern.permute.xlu0 %v4563_v1  ;;  %4610 = vst [vmem:[#allocation17_spill] sm:$0xff] %v3628_v52  ;;  %v3637_v54 = vld [vmem:[%s4554_s4 + $0xa0] sm:$0xff]  ;;  %v254_v56 = vld [vmem:[%s4551_s1 + $0x70] sm:$0xff] }
  0x44   : > { %532 = vperm.xlu0 %2973, %v244_v6   ;;  %2967 = vset.pattern.permute.xlu1 %v4559_v7  ;;  %4611 = vst [vmem:[#allocation18_spill] sm:$0xff] %v3637_v54  ;;  %v3654_v59 = vld [vmem:[%s4554_s4 + $0xb0] sm:$0xff] }
  0x45   : > { %284 = vperm.xlu1 %2967, %v242_v3   ;;  %4614 = vst [vmem:[#allocation21_spill] sm:$0xff] %v3654_v59 }
  0x48   : > { %544 = vperm.xlu0 %2973, %v247_v8  }
  0x49   : > { %2968 = vset.pattern.permute.xlu1 %v4563_v1 }
  0x4a   : > { %524 = vperm.xlu1 %2968, %v242_v3  }
  0x4c   : > { %552 = vperm.xlu0 %2973, %v3402_v9  }
  0x4e   : > { %528 = vperm.xlu1 %2968, %v243_v10  }
  0x50   : > { %560 = vperm.xlu0 %2973, %v3412_v11  }
  0x52   : > { %2969 = vset.pattern.permute.xlu1 %v4561_v0 }
  0x53   : > { %802 = vperm.xlu1 %2969, %v243_v10  }
  0x54   : > { %568 = vperm.xlu0 %2973, %v3417_v12  }
  0x57   : > { %2970 = vset.pattern.permute.xlu1 %v4559_v7 }
  0x58   : > { %576 = vperm.xlu0 %2973, %v3424_v13   ;;  %1097 = vperm.xlu1 %2970, %v3430_v14  }
  0x5c   : > { %584 = vperm.xlu0 %2973, %v3438_v15   ;;  %294 = vperm.xlu1 %2970, %v244_v6  }
  0x60   : > { %592 = vperm.xlu0 %2973, %v3444_v16   ;;  %299 = vperm.xlu1 %2970, %v245_v5  }
  0x64   : > { %600 = vperm.xlu0 %2973, %v3450_v17   ;;  %2971 = vset.pattern.permute.xlu1 %v4563_v1 }
  0x65   : > { %536 = vperm.xlu1 %2971, %v245_v5  }
  0x68   : > { %608 = vperm.xlu0 %2973, %v3457_v18  }
  0x69   : > { %2972 = vset.pattern.permute.xlu1 %v4561_v0 }
  0x6a   : > { %806 = vperm.xlu1 %2972, %v244_v6   ;;  %v3685_v6 = vld [vmem:[%s4554_s4 + $0x68] sm:$0xff] }
  0x6b   : > { %4620 = vst [vmem:[#allocation27_spill] sm:$0xff] %v3685_v6 }
  0x6c   : > { %616 = vperm.xlu0 %2973, %v3464_v19  }
  0x6e   : > { %2974 = vset.pattern.permute.xlu1 %v4559_v7 }
  0x6f   : > { %1107 = vperm.xlu1 %2974, %v1065_v20  }
  0x70   : > { %624 = vperm.xlu0 %2973, %v3473_v21  }
  0x73   : > { %1112 = vperm.xlu1 %2974, %v3480_v22  }
  0x74   : > { %632 = vperm.xlu0 %2973, %v3485_v23  }
  0x77   : > { %309 = vperm.xlu1 %2974, %v247_v8  }
  0x78   : > { %640 = vperm.xlu0 %2973, %v3492_v24  }
  0x7b   : > { %2975 = vset.pattern.permute.xlu1 %v4563_v1 }
  0x7c   : > { %3012 = vset.pattern.permute.xlu0 %v4559_v7  ;;  %540 = vperm.xlu1 %2975, %v246_v25  }
  0x7d   : > { %274 = vperm.xlu0 %3012, %v3373_v2   ;;  %v3671_v2 = vld [vmem:[%s4554_s4 + $0xc0] sm:$0xff] }
  0x7e   : > { %4617 = vst [vmem:[#allocation24_spill] sm:$0xff] %v3671_v2 }
  0x80   : > { %2976 = vset.pattern.permute.xlu1 %v4561_v0 }
  0x81   : > { %279 = vperm.xlu0 %3012, %v3383_v4   ;;  %814 = vperm.xlu1 %2976, %v246_v25  }
  0x85   : > { %289 = vperm.xlu0 %3012, %v243_v10   ;;  %818 = vperm.xlu1 %2976, %v247_v8  }
  0x89   : > { %1102 = vperm.xlu0 %3012, %v3506_v26   ;;  %2977 = vset.pattern.permute.xlu1 %v4559_v7 }
  0x8a   : > { %1122 = vperm.xlu1 %2977, %v3511_v27  }
  0x8d   : > { %304 = vperm.xlu0 %3012, %v246_v25   ;;  %v3717_v25 = vld [vmem:[%s4554_s4 + $0xe0] sm:$0xff] }
  0x8e   : > { %314 = vperm.xlu1 %2977, %v248_v28   ;;  %4624 = vst [vmem:[#allocation31_spill] sm:$0xff] %v3717_v25 }
  0x91   : > { %1117 = vperm.xlu0 %3012, %v3522_v29  }
  0x92   : > { %2978 = vset.pattern.permute.xlu1 %v4563_v1 }
  0x93   : > { %548 = vperm.xlu1 %2978, %v248_v28  }
  0x95   : > { %319 = vperm.xlu0 %3012, %v3402_v9  }
  0x97   : > { %2979 = vset.pattern.permute.xlu1 %v4561_v0 }
  0x98   : > { %822 = vperm.xlu1 %2979, %v248_v28  }
  0x99   : > { %1127 = vperm.xlu0 %3012, %v3530_v30  }
  0x9c   : > { %826 = vperm.xlu1 %2979, %v3402_v9   ;;  %v3695_v9 = vld [vmem:[%s4554_s4 + $0xd0] sm:$0xff] }
  0x9d   : > { %329 = vperm.xlu0 %3012, %v3412_v11   ;;  %4621 = vst [vmem:[#allocation28_spill] sm:$0xff] %v3695_v9 }
  0xa0   : > { %2980 = vset.pattern.permute.xlu1 %v4559_v7 }
  0xa1   : > { %1137 = vperm.xlu0 %3012, %v3539_v31   ;;  %1132 = vperm.xlu1 %2980, %v3544_v32  }
  0xa5   : > { %324 = vperm.xlu1 %2980, %v250_v33   ;;  %339 = vperm.xlu0 %3012, %v3417_v12  }
  0xa9   : > { %2981 = vset.pattern.permute.xlu1 %v4563_v1  ;;  %1147 = vperm.xlu0 %3012, %v3556_v34  }
  0xaa   : > { %556 = vperm.xlu1 %2981, %v250_v33  }
  0xad   : > { %349 = vperm.xlu0 %3012, %v3424_v13  }
  0xae   : > { %2982 = vset.pattern.permute.xlu1 %v4561_v0 }
  0xaf   : > { %830 = vperm.xlu1 %2982, %v250_v33  }
  0xb1   : > { %1157 = vperm.xlu0 %3012, %v3565_v35  }
  0xb3   : > { %834 = vperm.xlu1 %2982, %v3412_v11   ;;  %v256_v11 = vld [vmem:[%s4551_s1 + $0x80] sm:$0xff] }
  0xb5   : > { %359 = vperm.xlu0 %3012, %v3438_v15  }
  0xb6   : > { %v3575_v37 = vpop.permute.xlu1 %516  ;;  %v3577_v38 = vpop.permute.xlu0 %790 }
  0xb7   : > { %2983 = vset.pattern.permute.xlu1 %v4559_v7 }
  0xb8   : > { %1142 = vperm.xlu1 %2983, %v3572_v36  }
  0xb9   : > { %1167 = vperm.xlu0 %3012, %v3582_v39  }
  0xba   : > { %v3590_v41 = vpop.permute.xlu1 %520  ;;  %v3592_v42 = vpop.permute.xlu0 %798 }
  0xbc   : > { %334 = vperm.xlu1 %2983, %v252_v40  }
  0xbd   : > { %369 = vperm.xlu0 %3012, %v3444_v16  }
  0xbe   : > { %v3595_v43 = vpop.permute.xlu0 %810 }
  0xbf   : > { %v3602_v45 = vpop.permute.xlu1 %794 }
  0xc0   : > { %2984 = vset.pattern.permute.xlu1 %v4563_v1 }
  0xc1   : > { %564 = vperm.xlu1 %2984, %v252_v40   ;;  %1177 = vperm.xlu0 %3012, %v3600_v44  }
  0xc3   : > { %v3606_v46 = vpop.permute.xlu0 %532 }
  0xc4   : > { %v3608_v47 = vpop.permute.xlu1 %284 }
  0xc5   : > { %2985 = vset.pattern.permute.xlu1 %v4561_v0  ;;  %379 = vperm.xlu0 %3012, %v3450_v17  }
  0xc6   : > { %838 = vperm.xlu1 %2985, %v252_v40  }
  0xc7   : > { %v3617_v49 = vpop.permute.xlu0 %544 }
  0xc9   : > { %v3619_v50 = vpop.permute.xlu1 %524  ;;  %1187 = vperm.xlu0 %3012, %v3615_v48  }
  0xca   : > { %842 = vperm.xlu1 %2985, %v3417_v12   ;;  %v433_v12 = vlaneseq }
  0xcb   : > { %v3623_v51 = vpop.permute.xlu0 %552 }
  0xcc   : > { %4609 = vst [vmem:[#allocation16_spill] sm:$0xff] %v3623_v51 }
  0xcd   : > { %v3630_v53 = vpop.permute.xlu1 %528  ;;  %389 = vperm.xlu0 %3012, %v3457_v18  }
  0xce   : > { %2986 = vset.pattern.permute.xlu1 %v4559_v7 }
  0xcf   : > { %1152 = vperm.xlu1 %2986, %v3628_v52   ;;  %v3640_v55 = vpop.permute.xlu0 %560 }
  0xd0   : > { %4612 = vst [vmem:[#allocation19_spill] sm:$0xff] %v3640_v55 }
  0xd1   : > { %1197 = vperm.xlu0 %3012, %v3637_v54  }
  0xd2   : > { %v3646_v57 = vpop.permute.xlu1 %802 }
  0xd3   : > { %344 = vperm.xlu1 %2986, %v254_v56   ;;  %v3648_v58 = vpop.permute.xlu0 %568 }
  0xd4   : > { %4613 = vst [vmem:[#allocation20_spill] sm:$0xff] %v3648_v58 }
  0xd5   : > { %399 = vperm.xlu0 %3012, %v3464_v19  }
  0xd7   : > { %2987 = vset.pattern.permute.xlu1 %v4563_v1  ;;  %v3657_v60 = vpop.permute.xlu1 %1097  ;;  %v3659_v61 = vpop.permute.xlu0 %576 }
  0xd8   : > { %4615 = vst [vmem:[#allocation22_spill] sm:$0xff] %v3659_v61  ;;  %572 = vperm.xlu1 %2987, %v254_v56  }
  0xd9   : > { %1207 = vperm.xlu0 %3012, %v3654_v59  }
  0xdb   : > { %v3662_v62 = vpop.permute.xlu1 %294  ;;  %v3664_v63 = vpop.permute.xlu0 %584 }
  0xdc   : > { %4616 = vst [vmem:[#allocation23_spill] sm:$0xff] %v3664_v63  ;;  %2988 = vset.pattern.permute.xlu1 %v4561_v0 }
  0xdd   : > { %846 = vperm.xlu1 %2988, %v254_v56   ;;  %409 = vperm.xlu0 %3012, %v3473_v21   ;;  %v434_v21 = vshrl.u32 %v433_v12, 7  ;;  %v239_v56 = vld [vmem:[%s236_s25] sm:$0x77]  ;;  %s2802_s25 = sshll.u32 %s229_s23, 3 }
  0xde   : > { %s231_s30 = scalar_lea.vmem [#allocation5], %s2802_s25 }
  0xdf   : > { %v3673_v3 = vpop.permute.xlu1 %299  ;;  %v3675_v4 = vpop.permute.xlu0 %592  ;;  %v645_v33 = vsub.s32 1, %v434_v21  ;;  %v649_v40 = vsub.s32 5, %v434_v21  ;;  %v439_v12 = vsub.s32 4, %v434_v21  ;;  %v923_v0 = vsub.s32 6, %v434_v21  ;;  %s2725_s6 = sshll.u32 %s231_s30, 4  ;;  %s4510_s6 = int_to_ptr.vmem [resolvable:$true] %s2725_s6 }
  0xe0   : > { %4618 = vst [vmem:[#allocation25_spill] sm:$0xff] %v3675_v4  ;;  %s3181_s11 = scalar_lea.vmem %s4510_s6, 128  ;;  %p3188_p2 = scmp.lt.s32.totalorder %s4510_s6, %s3186_s12 }
  0xe1   : > { %850 = vperm.xlu1 %2988, %v3424_v13   ;;  %1217 = vperm.xlu0 %3012, %v3671_v2   ;;  %v650_v4 = vrot.slane %v239_v56, %v649_v40  ;;  %v440_v61 = vrot.slane %v239_v56, %v439_v12  ;;  %p3182_p6 = scmp.ne.s32.totalorder %s4510_s6, %s3181_s11  ;;  %p3189_p3 = scmp.lt.s32.totalorder %s3187_s13, %s3181_s11 }
  0xe3   : > { %v3680_v5 = vpop.permute.xlu0 %600  ;;  %v3739_v36 = vrot.slane %v650_v4, %v645_v33  ;;  %p3183_p10 = pnand %p3182_p6, %p4662_p9  ;;  %p3190_p4 = por %p3189_p3, %p3188_p2 }
  0xe4   : > { %4619 = vst [vmem:[#allocation26_spill] sm:$0xff] %v3680_v5  ;;  %v3687_v8 = vpop.permute.xlu1 %536 }
  0xe5   : > { %2989 = vset.pattern.permute.xlu1 %v4559_v7  ;;  %419 = vperm.xlu0 %3012, %v3485_v23   ;;  %v919_v7 = vsub.s32 2, %v434_v21  ;;  %p3184_p12 = pneg %p3183_p10 }
  0xe6   : > { %1162 = vperm.xlu1 %2989, %v3685_v6  }
  0xe7   : > { %v3697_v10 = vpop.permute.xlu0 %608  ;;  %v920_v58 = vrot.slane %v239_v56, %v919_v7  ;;  %p3191_p7 = pnand %p3190_p4, %p3184_p12 }
  0xe8   : > { %4622 = vst [vmem:[#allocation29_spill] sm:$0xff] %v3697_v10  ;;  %v4627_v10 = vmov 2  }
  0xe9   : > { %v3702_v13 = vpop.permute.xlu1 %806  ;;  %1227 = vperm.xlu0 %3012, %v3695_v9   ;;  %v3747_v12 = vrot.slane %v920_v58, %v919_v7 }
  0xea   : > { %354 = vperm.xlu1 %2989, %v256_v11  }
  0xeb   : > { %v3705_v20 = vpop.permute.xlu0 %616  ;;  %v935_v4 = vmul.f32 %v3747_v12, %v3577_v38  ;;  %v937_v18 = vmul.f32 %v3747_v12, %v3602_v45  ;;  %v3797_v22 = vmul.f32 %v3747_v12, %v3595_v43  ;;  %v943_v2 = vmul.f32 %v3747_v12, %v3702_v13 }
  0xec   : > { %4623 = vst [vmem:[#allocation30_spill] sm:$0xff] %v3705_v20  ;;  %v3727_v20 = vld [vmem:[%s4554_s4 + $0xf8] sm:$0xff] }
  0xed   : > { %429 = vperm.xlu0 %3012, %v3492_v24   ;;  %v435_v24 = vsub.s32 0, %v434_v21  ;;  %4626 = vst [vmem:[#allocation33_spill] sm:$0xff] %v3727_v20  ;;  %v924_v21 = vrot.slane %v239_v56, %v923_v0  ;;  %v3754_v0 = vld [vmem:[%s4554_s4 + $0x78] sm:$0xff] }
  0xee   : > { %2990 = vset.pattern.permute.xlu1 %v4563_v1  ;;  %v3712_v23 = vpop.permute.xlu1 %1107  ;;  %4631 = vst [vmem:[#allocation36_spill] sm:$0xff] %v3754_v0 }
  0xef   : > { %580 = vperm.xlu1 %2990, %v256_v11   ;;  %v3719_v28 = vpop.permute.xlu0 %624  ;;  %v436_v63 = vrot.slane %v239_v56, %v435_v24  ;;  %v3744_v40 = vrot.slane %v440_v61, %v435_v24  ;;  %v666_v61 = vmul.f32 %v3739_v36, %v3619_v50 }
  0xf0   : > { %4625 = vst [vmem:[#allocation32_spill] sm:$0xff] %v3719_v28  ;;  %v646_v28 = vrot.slane %v239_v56, %v645_v33 }
  0xf1   : > { %1237 = vperm.xlu0 %3012, %v3717_v25   ;;  %v456_v56 = vmul.f32 %v3744_v40, %v3608_v47 }
  0xf2   : > { %v3722_v1 = vpop.permute.xlu1 %1112  ;;  %v3737_v52 = vrot.slane %v646_v28, %v645_v33  ;;  %v4632_v33 = vmov 0  }
  0xf3   : > { %2991 = vset.pattern.permute.xlu1 %v4627_v10  ;;  %v3730_v5 = vpop.permute.xlu0 %632 }
  0xf4   : > { %4628 = vst [vmem:[#allocation34_spill] sm:$0xff] %v3730_v5  ;;  %854 = vperm.xlu1 %2991, %v256_v11   ;;  %v3742_v5 = vrot.slane %v436_v63, %v435_v24  ;;  %v4630_v11 = vmov 1   ;;  %v661_v58 = vmul.f32 %v3737_v52, %v3575_v37  ;;  %v671_v9 = vmul.f32 %v3737_v52, %v3687_v8 }
  0xf5   : > { %1252 = vperm.xlu0 %3012, %v3727_v20   ;;  %v3749_v20 = vrot.slane %v924_v21, %v919_v7  ;;  %v662_v7 = vmul.f32 %v3739_v36, %v3575_v37  ;;  %v663_v37 = vmul.f32 %v3737_v52, %v3590_v41 }
  0xf6   : > { %v3733_v19 = vpop.permute.xlu1 %309 }
  0xf7   : > { %v3735_v6 = vpop.permute.xlu0 %640  ;;  %v940_v55 = vmul.f32 %v3749_v20, %v3592_v42 }
  0xf8   : > { %4629 = vst [vmem:[#allocation35_spill] sm:$0xff] %v3735_v6  ;;  %858 = vperm.xlu1 %2991, %v3438_v15   ;;  %v665_v15 = vmul.f32 %v3737_v52, %v3619_v50  ;;  %v455_v50 = vmul.f32 %v3742_v5, %v3608_v47  ;;  %v939_v6 = vmul.f32 %v3747_v12, %v3592_v42  ;;  %v258_v47 = vld [vmem:[%s4551_s1 + $0x90] sm:$0xff] }
  0xf9   : > { %3016 = vset.pattern.permute.xlu0 %v4630_v11  ;;  %v3801_v42 = vmul.f32 %v3749_v20, %v3595_v43  ;;  %v668_v43 = vmul.f32 %v3739_v36, %v3630_v53 }
  0xfa   : > { %1452 = vperm.xlu0 %3016, %v3506_v26   ;;  %v936_v26 = vmul.f32 %v3749_v20, %v3577_v38  ;;  %v664_v38 = vmul.f32 %v3739_v36, %v3590_v41  ;;  %v938_v41 = vmul.f32 %v3749_v20, %v3602_v45 }
  0xfb   : > { %v3761_v63 = vpop.permute.xlu1 %540 }
  0xfc   : > { %v275_v28 = vpop.permute.xlu0 %274  ;;  %2992 = vset.pattern.permute.xlu1 %v4632_v33 }
  0xfd   : > { %v451_v24 = vmul.f32 %v3742_v5, %v275_v28  ;;  %v452_v21 = vmul.f32 %v3744_v40, %v275_v28  ;;  %1172 = vperm.xlu1 %2992, %v3754_v0   ;;  %v729_v28 = vadd.f32 %v665_v15, %v455_v50  ;;  %v730_v0 = vadd.f32 %v666_v61, %v456_v56 }
  0xfe   : > { %1464 = vperm.xlu0 %3016, %v3522_v29   ;;  %v669_v15 = vmul.f32 %v3737_v52, %v3606_v46  ;;  %v670_v61 = vmul.f32 %v3739_v36, %v3606_v46  ;;  %v941_v46 = vmul.f32 %v3747_v12, %v3646_v57 }
  0xff   : > { %v725_v32 = vadd.f32 %v661_v58, %v451_v24  ;;  %v726_v27 = vadd.f32 %v662_v7, %v452_v21  ;;  %v667_v7 = vmul.f32 %v3737_v52, %v3630_v53  ;;  %v1003_v24 = vadd.f32 %v939_v6, %v729_v28 }
 0x100   : > { %v280_v14 = vpop.permute.xlu0 %279  ;;  %v3803_v29 = vpop.permute.xlu1 %814  ;;  %v1004_v21 = vadd.f32 %v940_v55, %v730_v0  ;;  %v672_v53 = vmul.f32 %v3739_v36, %v3687_v8  ;;  %v461_v55 = vmul.f32 %v3742_v5, %v3673_v3 }
 0x101   : > { %v453_v58 = vmul.f32 %v3742_v5, %v280_v14  ;;  %v454_v45 = vmul.f32 %v3744_v40, %v280_v14  ;;  %364 = vperm.xlu1 %2992, %v258_v47   ;;  %v1000_v50 = vadd.f32 %v936_v26, %v726_v27  ;;  %v999_v56 = vadd.f32 %v935_v4, %v725_v32 }
 0x102   : > { %1472 = vperm.xlu0 %3016, %v3530_v30   ;;  %v942_v14 = vmul.f32 %v3749_v20, %v3646_v57  ;;  %v459_v30 = vmul.f32 %v3742_v5, %v3662_v62  ;;  %v462_v57 = vmul.f32 %v3744_v40, %v3673_v3 }
 0x103   : > { %v727_v25 = vadd.f32 %v663_v37, %v453_v58  ;;  %v728_v51 = vadd.f32 %v664_v38, %v454_v45  ;;  %v1256_v8 = vadd.f32 %v3657_v60, %v1000_v50  ;;  %v1255_v4 = vadd.f32 %v3657_v60, %v999_v56 }
 0x104   : > { %v290_v27 = vpop.permute.xlu0 %289  ;;  %v3824_v32 = vpop.permute.xlu1 %818  ;;  %v460_v58 = vmul.f32 %v3744_v40, %v3662_v62  ;;  %v735_v45 = vadd.f32 %v671_v9, %v461_v55  ;;  %v1259_v56 = vadd.f32 %v3712_v23, %v1003_v24 }
 0x105   : > { %v457_v6 = vmul.f32 %v3742_v5, %v290_v27  ;;  %v458_v0 = vmul.f32 %v3744_v40, %v290_v27  ;;  %2993 = vset.pattern.permute.xlu1 %v4630_v11  ;;  %v1001_v38 = vadd.f32 %v937_v18, %v727_v25  ;;  %v1002_v28 = vadd.f32 %v938_v41, %v728_v51 }
 0x106   : > { %588 = vperm.xlu1 %2993, %v258_v47   ;;  %1480 = vperm.xlu0 %3016, %v3539_v31   ;;  %v736_v27 = vadd.f32 %v672_v53, %v462_v57  ;;  %v944_v31 = vmul.f32 %v3749_v20, %v3702_v13  ;;  %v1260_v18 = vadd.f32 %v3712_v23, %v1004_v21  ;;  %v1320_v51 = vmax.f32 %v1256_v8, 0.0 }
 0x107   : > { %v731_v26 = vadd.f32 %v667_v7, %v457_v6  ;;  %v732_v37 = vadd.f32 %v668_v43, %v458_v0  ;;  %v1319_v62 = vmax.f32 %v1255_v4, 0.0  ;;  %v733_v43 = vadd.f32 %v669_v15, %v459_v30 }
 0x108   : > { %v1103_v3 = vpop.permute.xlu0 %1102  ;;  %v734_v13 = vadd.f32 %v670_v61, %v460_v58  ;;  %v1009_v21 = vadd.f32 %v3797_v22, %v735_v45  ;;  %v1324_v6 = vmax.f32 %v1260_v18, 0.0  ;;  %v674_v58 = vmul.f32 %v3739_v36, %v3761_v63 }
 0x109   : > { %v1005_v17 = vadd.f32 %v941_v46, %v731_v26  ;;  %v1006_v59 = vadd.f32 %v942_v14, %v732_v37  ;;  %v1257_v50 = vadd.f32 %v1103_v3, %v1001_v38  ;;  %v1123_v54 = vpop.permute.xlu1 %1122  ;;  %v1258_v60 = vadd.f32 %v1103_v3, %v1002_v28  ;;  %v260_v26 = vld [vmem:[%s4551_s1 + $0xa0] sm:$0xff] }
 0x10a   : > { %2994 = vset.pattern.permute.xlu1 %v4627_v10  ;;  %1488 = vperm.xlu0 %3016, %v3556_v34   ;;  %v1010_v34 = vadd.f32 %v3801_v42, %v736_v27  ;;  %v1265_v23 = vadd.f32 %v1123_v54, %v1009_v21  ;;  %v3859_v42 = vld [vmem:[%s4554_s4 + $0x88] sm:$0xff]  ;;  %v675_v27 = vmul.f32 %v3737_v52, %v3617_v49 }
 0x10b   : > { %862 = vperm.xlu1 %2994, %v258_v47   ;;  %v1322_v9 = vmax.f32 %v1258_v60, 0.0  ;;  %v1321_v25 = vmax.f32 %v1257_v50, 0.0  ;;  %v1262_v41 = vadd.f32 %v3722_v1, %v1006_v59  ;;  %v1261_v7 = vadd.f32 %v3722_v1, %v1005_v17 }
 0x10c   : > { %v305_v46 = vpop.permute.xlu0 %304  ;;  %v1007_v1 = vadd.f32 %v943_v2, %v733_v43  ;;  %v1008_v17 = vadd.f32 %v944_v31, %v734_v13  ;;  %v1323_v59 = vmax.f32 %v1259_v56, 0.0  ;;  %v1266_v15 = vadd.f32 %v1123_v54, %v1010_v34  ;;  %v4633_v43 = vld [vmem:[#allocation18_spill] sm:$0xff] }
 0x10d   : > { %v3851_v14 = vpop.permute.xlu1 %314  ;;  %v1416_v53 = vpack.c.bf16 %v1322_v9, %v1320_v51  ;;  %v1415_v55 = vpack.c.bf16 %v1321_v25, %v1319_v62  ;;  %v1326_v47 = vmax.f32 %v1262_v41, 0.0  ;;  %v1325_v0 = vmax.f32 %v1261_v7, 0.0 }
 0x10e   : > { %1496 = vperm.xlu0 %3016, %v3565_v35   ;;  %v1329_v54 = vmax.f32 %v1265_v23, 0.0  ;;  %v1330_v8 = vmax.f32 %v1266_v15, 0.0  ;;  %v464_v4 = vmul.f32 %v3744_v40, %v305_v46  ;;  %v463_v37 = vmul.f32 %v3742_v5, %v305_v46  ;;  %v4636_v15 = vld [vmem:[#allocation24_spill] sm:$0xff] }
 0x10f   : > { %866 = vperm.xlu1 %2994, %v3444_v16   ;;  %1735 = vmatprep.subr.bf16.mxu0 %v1416_v53  ;;  %v1418_v61 = vpack.c.bf16 %v1326_v47, %v1324_v6  ;;  %v1417_v16 = vpack.c.bf16 %v1325_v0, %v1323_v59  ;;  %v673_v3 = vmul.f32 %v3737_v52, %v3761_v63  ;;  %v4635_v59 = vld [vmem:[#allocation9_spill] sm:$0xff] }
 0x110   : > { %v1118_v22 = vpop.permute.xlu0 %1117  ;;  %1736 = vmatpush1.bf16.msra.mxu0 %v1415_v55  ;;  %v676_v50 = vmul.f32 %v3739_v36, %v3617_v49  ;;  %v465_v60 = vmul.f32 %v3742_v5, %v3733_v19  ;;  %v738_v31 = vadd.f32 %v674_v58, %v464_v4  ;;  %v948_v51 = vmul.f32 %v3749_v20, %v3803_v29 }
 0x111   : > { %v1263_v24 = vadd.f32 %v1118_v22, %v1007_v1  ;;  %v1264_v30 = vadd.f32 %v1118_v22, %v1008_v17  ;;  %1737 = vmatprep.subr.bf16.mxu0 %v1418_v61  ;;  %v737_v18 = vadd.f32 %v673_v3, %v463_v37  ;;  %v949_v63 = vmul.f32 %v3747_v12, %v3824_v32  ;;  %v3908_v22 = vld [vmem:[%s4554_s4 + $0x98] sm:$0xff] }
 0x112   : > { %v3861_v35 = vpop.permute.xlu1 %548  ;;  %1504 = vperm.xlu0 %3016, %v3582_v39   ;;  %v950_v49 = vmul.f32 %v3749_v20, %v3824_v32  ;;  %v947_v9 = vmul.f32 %v3747_v12, %v3803_v29  ;;  %v1012_v7 = vadd.f32 %v948_v51, %v738_v31  ;;  %v4634_v29 = vld [vmem:[#allocation21_spill] sm:$0xff]  ;;  %v467_v58 = vmul.f32 %v3742_v5, %v3851_v14 }
 0x113   : > { %v1327_v2 = vmax.f32 %v1263_v24, 0.0  ;;  %v1328_v57 = vmax.f32 %v1264_v30, 0.0  ;;  %2995 = vset.pattern.permute.xlu1 %v4632_v33  ;;  %v4637_v24 = vld [vmem:[#allocation28_spill] sm:$0xff] }
 0x114   : > { %1182 = vperm.xlu1 %2995, %v3859_v42   ;;  %1738 = vmatpush1.bf16.msra.mxu0 %v1417_v16  ;;  %v3871_v38 = vpop.permute.xlu0 %319  ;;  %v262_v30 = vld [vmem:[%s4551_s1 + $0xb0] sm:$0xff]  ;;  %v677_v16 = vmul.f32 %v3737_v52, %v3861_v35 }
 0x115   : > { %v1420_v39 = vpack.c.bf16 %v1330_v8, %v1328_v57  ;;  %v1419_v28 = vpack.c.bf16 %v1329_v54, %v1327_v2  ;;  %v678_v2 = vmul.f32 %v3739_v36, %v3861_v35  ;;  %v4638_v54 = vld [vmem:[#allocation16_spill] sm:$0xff]  ;;  %v470_v37 = vmul.f32 %v3744_v40, %v3871_v38 }
 0x116   : > { %1512 = vperm.xlu0 %3016, %v3600_v44   ;;  %v466_v44 = vmul.f32 %v3744_v40, %v3733_v19  ;;  %v739_v19 = vadd.f32 %v675_v27, %v465_v60  ;;  %v679_v8 = vmul.f32 %v3737_v52, %v4638_v54  ;;  %v680_v4 = vmul.f32 %v3739_v36, %v4638_v54 }
 0x117   : > { %v3876_v45 = vpop.permute.xlu1 %822  ;;  %1739 = vmatprep.subr.bf16.mxu0 %v1420_v39  ;;  %v468_v35 = vmul.f32 %v3744_v40, %v3851_v14 }
 0x118   : > { %374 = vperm.xlu1 %2995, %v260_v26   ;;  %1740 = vmatpush1.bf16.msra.mxu0 %v1419_v28  ;;  %v1128_v25 = vpop.permute.xlu0 %1127  ;;  %v740_v41 = vadd.f32 %v676_v50, %v466_v44  ;;  %v1013_v46 = vadd.f32 %v949_v63, %v739_v19  ;;  %v4639_v28 = vld [vmem:[#allocation31_spill] sm:$0xff]  ;;  %v951_v27 = vmul.f32 %v3747_v12, %v3876_v45 }
 0x119   : > { %v1268_v56 = vadd.f32 %v1128_v25, %v1012_v7  ;;  %v952_v3 = vmul.f32 %v3749_v20, %v3876_v45  ;;  %v741_v50 = vadd.f32 %v677_v16, %v467_v58  ;;  %v742_v60 = vadd.f32 %v678_v2, %v468_v35 }
 0x11a   : > { %1520 = vperm.xlu0 %3016, %v3615_v48   ;;  %v1011_v48 = vadd.f32 %v947_v9, %v737_v18  ;;  %v1014_v13 = vadd.f32 %v950_v49, %v740_v41  ;;  %v744_v31 = vadd.f32 %v680_v4, %v470_v37 }
 0x11b   : > { %v827_v62 = vpop.permute.xlu1 %826  ;;  %v1332_v6 = vmax.f32 %v1268_v56, 0.0  ;;  %v1015_v45 = vadd.f32 %v951_v27, %v741_v50  ;;  %v1016_v49 = vadd.f32 %v952_v3, %v742_v60  ;;  %v4646_v27 = vld [vmem:[#allocation15_spill] sm:$0xff] }
 0x11c   : > { %2996 = vset.pattern.permute.xlu1 %v4630_v11  ;;  %v1267_v21 = vadd.f32 %v1128_v25, %v1011_v48  ;;  %v330_v57 = vpop.permute.xlu0 %329  ;;  %v953_v18 = vmul.f32 %v3747_v12, %v827_v62  ;;  %v954_v14 = vmul.f32 %v3749_v20, %v827_v62  ;;  %v4640_v48 = vld [vmem:[#allocation8_spill] sm:$0xff] }
 0x11d   : > { %596 = vperm.xlu1 %2996, %v260_v26   ;;  %v473_v2 = vmul.f32 %v3742_v5, %v330_v57  ;;  %v474_v54 = vmul.f32 %v3744_v40, %v330_v57 }
 0x11e   : > { %1528 = vperm.xlu0 %3016, %v4633_v43   ;;  %v1331_v0 = vmax.f32 %v1267_v21, 0.0  ;;  %v1018_v41 = vadd.f32 %v954_v14, %v744_v31 }
 0x120   : > { %v1133_v53 = vpop.permute.xlu1 %1132  ;;  %v1138_v63 = vpop.permute.xlu0 %1137 }
 0x121   : > { %v1269_v32 = vadd.f32 %v1133_v53, %v1013_v46  ;;  %v1270_v55 = vadd.f32 %v1133_v53, %v1014_v13  ;;  %2997 = vset.pattern.permute.xlu1 %v4627_v10  ;;  %v1271_v9 = vadd.f32 %v1138_v63, %v1015_v45  ;;  %v1272_v25 = vadd.f32 %v1138_v63, %v1016_v49 }
 0x122   : > { %870 = vperm.xlu1 %2997, %v260_v26   ;;  %1536 = vperm.xlu0 %3016, %v4634_v29   ;;  %v469_v26 = vmul.f32 %v3742_v5, %v3871_v38  ;;  %v3940_v38 = vld [vmem:[%s4554_s4 + $0xf0] sm:$0xff] }
 0x123   : > { %v1333_v34 = vmax.f32 %v1269_v32, 0.0  ;;  %v1334_v47 = vmax.f32 %v1270_v55, 0.0  ;;  %v1335_v56 = vmax.f32 %v1271_v9, 0.0  ;;  %v1336_v46 = vmax.f32 %v1272_v25, 0.0  ;;  %v4641_v32 = vld [vmem:[#allocation12_spill] sm:$0xff] }
 0x124   : > { %v3901_v1 = vpop.permute.xlu1 %324  ;;  %v743_v44 = vadd.f32 %v679_v8, %v469_v26 }
 0x125   : > { %v1422_v17 = vpack.c.bf16 %v1334_v47, %v1332_v6  ;;  %v1421_v23 = vpack.c.bf16 %v1333_v34, %v1331_v0  ;;  %v4642_v6 = vld [vmem:[#allocation10_spill] sm:$0xff]  ;;  %v4643_v47 = vld [vmem:[#allocation13_spill] sm:$0xff]  ;;  %v471_v8 = vmul.f32 %v3742_v5, %v3901_v1 }
 0x126   : > { %874 = vperm.xlu1 %2997, %v4635_v59   ;;  %1544 = vperm.xlu0 %3016, %v4636_v15   ;;  %v1017_v19 = vadd.f32 %v953_v18, %v743_v44  ;;  %v3956_v34 = vld [vmem:[%s4554_s4 + $0xa8] sm:$0xff] }
 0x127   : > { %1741 = vmatprep.subr.bf16.mxu0 %v1422_v17  ;;  %v4644_v15 = vld [vmem:[#allocation14_spill] sm:$0xff] }
 0x128   : > { %1742 = vmatpush1.bf16.msra.mxu0 %v1421_v23  ;;  %v264_v23 = vld [vmem:[%s4551_s1 + $0xc0] sm:$0xff] }
 0x129   : > { %v557_v61 = vpop.permute.xlu1 %556 }
 0x12a   : > { %2998 = vset.pattern.permute.xlu1 %v4632_v33  ;;  %1552 = vperm.xlu0 %3016, %v4637_v24   ;;  %v681_v17 = vmul.f32 %v3737_v52, %v557_v61  ;;  %v682_v59 = vmul.f32 %v3739_v36, %v557_v61  ;;  %v4645_v24 = vld [vmem:[#allocation19_spill] sm:$0xff]  ;;  %v472_v61 = vmul.f32 %v3744_v40, %v3901_v1 }
 0x12b   : > { %1192 = vperm.xlu1 %2998, %v3908_v22   ;;  %v684_v16 = vmul.f32 %v3739_v36, %v4645_v24 }
 0x12c   : > { %v745_v58 = vadd.f32 %v681_v17, %v471_v8  ;;  %v746_v35 = vadd.f32 %v682_v59, %v472_v61  ;;  %v4651_v17 = vld [vmem:[#allocation20_spill] sm:$0xff] }
 0x12d   : > { %v748_v50 = vadd.f32 %v684_v16, %v474_v54  ;;  %v687_v59 = vmul.f32 %v3737_v52, %v4651_v17 }
 0x12e   : > { %v831_v39 = vpop.permute.xlu1 %830  ;;  %1560 = vperm.xlu0 %3016, %v4639_v28   ;;  %v340_v28 = vpop.permute.xlu0 %339 }
 0x12f   : > { %384 = vperm.xlu1 %2998, %v262_v30   ;;  %v955_v4 = vmul.f32 %v3747_v12, %v831_v39  ;;  %v956_v26 = vmul.f32 %v3749_v20, %v831_v39  ;;  %v4647_v39 = vld [vmem:[#allocation17_spill] sm:$0xff] }
 0x131   : > { %v1019_v57 = vadd.f32 %v955_v4, %v745_v58  ;;  %v1020_v60 = vadd.f32 %v956_v26, %v746_v35 }
 0x132   : > { %v835_v51 = vpop.permute.xlu1 %834  ;;  %1568 = vperm.xlu0 %3016, %v3940_v38   ;;  %v1148_v18 = vpop.permute.xlu0 %1147 }
 0x133   : > { %2999 = vset.pattern.permute.xlu1 %v4630_v11  ;;  %v957_v44 = vmul.f32 %v3747_v12, %v835_v51  ;;  %v958_v31 = vmul.f32 %v3749_v20, %v835_v51  ;;  %v1276_v45 = vadd.f32 %v1148_v18, %v1020_v60  ;;  %v1275_v49 = vadd.f32 %v1148_v18, %v1019_v57 }
 0x134   : > { %604 = vperm.xlu1 %2999, %v262_v30  }
 0x135   : > { %v1022_v63 = vadd.f32 %v958_v31, %v748_v50 }
 0x136   : > { %3017 = vset.pattern.permute.xlu0 %v4627_v10  ;;  %v350_v8 = vpop.permute.xlu0 %349 }
 0x137   : > { %v1143_v7 = vpop.permute.xlu1 %1142  ;;  %2058 = vperm.xlu0 %3017, %v4640_v48   ;;  %v1340_v48 = vmax.f32 %v1276_v45, 0.0 }
 0x138   : > { %v1273_v43 = vadd.f32 %v1143_v7, %v1017_v19  ;;  %v1274_v62 = vadd.f32 %v1143_v7, %v1018_v41  ;;  %3000 = vset.pattern.permute.xlu1 %v4627_v10  ;;  %v4648_v41 = vld [vmem:[#allocation27_spill] sm:$0xff] }
 0x139   : > { %878 = vperm.xlu1 %3000, %v262_v30   ;;  %v683_v30 = vmul.f32 %v3737_v52, %v4645_v24  ;;  %v478_v24 = vmul.f32 %v3744_v40, %v340_v28 }
 0x13a   : > { %v1337_v13 = vmax.f32 %v1273_v43, 0.0  ;;  %v1338_v21 = vmax.f32 %v1274_v62, 0.0  ;;  %v1339_v43 = vmax.f32 %v1275_v49, 0.0 }
 0x13b   : > { %v3949_v53 = vpop.permute.xlu1 %334  ;;  %2070 = vperm.xlu0 %3017, %v4641_v32   ;;  %v747_v3 = vadd.f32 %v683_v30, %v473_v2  ;;  %v3993_v32 = vld [vmem:[%s4554_s4 + $0xb8] sm:$0xff] }
 0x13c   : > { %v1424_v55 = vpack.c.bf16 %v1338_v21, %v1336_v46  ;;  %v1423_v29 = vpack.c.bf16 %v1337_v13, %v1335_v56  ;;  %v4649_v13 = vld [vmem:[#allocation11_spill] sm:$0xff]  ;;  %v4650_v21 = vld [vmem:[#allocation36_spill] sm:$0xff]  ;;  %v475_v30 = vmul.f32 %v3742_v5, %v3949_v53 }
 0x13d   : > { %882 = vperm.xlu1 %3000, %v4642_v6   ;;  %v1021_v14 = vadd.f32 %v957_v44, %v747_v3 }
 0x13e   : > { %1743 = vmatprep.subr.bf16.mxu0 %v1424_v55 }
 0x13f   : > { %1744 = vmatpush1.bf16.msra.mxu0 %v1423_v29  ;;  %2078 = vperm.xlu0 %3017, %v4643_v47   ;;  %v266_v47 = vld [vmem:[%s4551_s1 + $0xd0] sm:$0xff] }
 0x140   : > { %v565_v0 = vpop.permute.xlu1 %564 }
 0x141   : > { %3001 = vset.pattern.permute.xlu1 %v4632_v33  ;;  %v685_v29 = vmul.f32 %v3737_v52, %v565_v0  ;;  %v686_v6 = vmul.f32 %v3739_v36, %v565_v0  ;;  %v476_v0 = vmul.f32 %v3744_v40, %v3949_v53 }
 0x142   : > { %1202 = vperm.xlu1 %3001, %v3956_v34  }
 0x143   : > { %2086 = vperm.xlu0 %3017, %v4644_v15   ;;  %v477_v15 = vmul.f32 %v3742_v5, %v340_v28  ;;  %v749_v61 = vadd.f32 %v685_v29, %v475_v30  ;;  %v750_v4 = vadd.f32 %v686_v6, %v476_v0  ;;  %v481_v6 = vmul.f32 %v3742_v5, %v350_v8  ;;  %v4653_v30 = vld [vmem:[#allocation33_spill] sm:$0xff] }
 0x145   : > { %v839_v37 = vpop.permute.xlu1 %838  ;;  %v751_v26 = vadd.f32 %v687_v59, %v477_v15 }
 0x146   : > { %394 = vperm.xlu1 %3001, %v264_v23   ;;  %v959_v16 = vmul.f32 %v3747_v12, %v839_v37  ;;  %v960_v2 = vmul.f32 %v3749_v20, %v839_v37  ;;  %v1158_v37 = vpop.permute.xlu0 %1157 }
 0x147   : > { %2094 = vperm.xlu0 %3017, %v4646_v27  }
 0x148   : > { %v1023_v28 = vadd.f32 %v959_v16, %v749_v61  ;;  %v1024_v35 = vadd.f32 %v960_v2, %v750_v4 }
 0x149   : > { %v843_v1 = vpop.permute.xlu1 %842 }
 0x14a   : > { %3002 = vset.pattern.permute.xlu1 %v4630_v11  ;;  %v961_v27 = vmul.f32 %v3747_v12, %v843_v1  ;;  %v962_v3 = vmul.f32 %v3749_v20, %v843_v1  ;;  %v1280_v60 = vadd.f32 %v1158_v37, %v1024_v35  ;;  %v1279_v44 = vadd.f32 %v1158_v37, %v1023_v28  ;;  %v4027_v1 = vld [vmem:[%s4554_s4 + $0xc8] sm:$0xff] }
 0x14b   : > { %612 = vperm.xlu1 %3002, %v264_v23   ;;  %2102 = vperm.xlu0 %3017, %v4647_v39  }
 0x14c   : > { %v1025_v50 = vadd.f32 %v961_v27, %v751_v26  ;;  %v1344_v45 = vmax.f32 %v1280_v60, 0.0  ;;  %v1343_v49 = vmax.f32 %v1279_v44, 0.0 }
 0x14e   : > { %v1153_v9 = vpop.permute.xlu1 %1152 }
 0x14f   : > { %v1277_v25 = vadd.f32 %v1153_v9, %v1021_v14  ;;  %v1278_v19 = vadd.f32 %v1153_v9, %v1022_v63  ;;  %3003 = vset.pattern.permute.xlu1 %v4627_v10  ;;  %2110 = vperm.xlu0 %3017, %v4648_v41   ;;  %v3125_v41 = vld [vmem:[%s4551_s1 + $0xd8] sm:$0xff] }
 0x150   : > { %886 = vperm.xlu1 %3003, %v264_v23   ;;  %v688_v23 = vmul.f32 %v3739_v36, %v4651_v17 }
 0x151   : > { %v1341_v51 = vmax.f32 %v1277_v25, 0.0  ;;  %v1342_v7 = vmax.f32 %v1278_v19, 0.0 }
 0x152   : > { %v3986_v62 = vpop.permute.xlu1 %344  ;;  %v752_v58 = vadd.f32 %v688_v23, %v478_v24  ;;  %v360_v24 = vpop.permute.xlu0 %359 }
 0x153   : > { %v1426_v56 = vpack.c.bf16 %v1342_v7, %v1340_v48  ;;  %v1425_v46 = vpack.c.bf16 %v1341_v51, %v1339_v43  ;;  %2118 = vperm.xlu0 %3017, %v4650_v21   ;;  %v4038_v51 = vld [vmem:[%s4554_s4 + $0xd8] sm:$0xff]  ;;  %v4045_v48 = vld [vmem:[%s4554_s4 + $0xe8] sm:$0xff]  ;;  %v479_v17 = vmul.f32 %v3742_v5, %v3986_v62 }
 0x154   : > { %890 = vperm.xlu1 %3003, %v4649_v13   ;;  %v1026_v57 = vadd.f32 %v962_v3, %v752_v58  ;;  %v4652_v13 = vld [vmem:[#allocation22_spill] sm:$0xff] }
 0x155   : > { %1745 = vmatprep.subr.bf16.mxu0 %v1426_v56  ;;  %v691_v21 = vmul.f32 %v3737_v52, %v4652_v13  ;;  %v692_v29 = vmul.f32 %v3739_v36, %v4652_v13 }
 0x156   : > { %1746 = vmatpush1.bf16.msra.mxu0 %v1425_v46  ;;  %v268_v46 = vld [vmem:[%s4551_s1 + $0xe0] sm:$0xff] }
 0x157   : > { %v3995_v55 = vpop.permute.xlu1 %572  ;;  %2126 = vperm.xlu0 %3017, %v3859_v42   ;;  %v755_v2 = vadd.f32 %v691_v21, %v481_v6  ;;  %v4654_v21 = vld [vmem:[#allocation23_spill] sm:$0xff] }
 0x158   : > { %3004 = vset.pattern.permute.xlu1 %v4632_v33  ;;  %v689_v43 = vmul.f32 %v3737_v52, %v3995_v55  ;;  %v690_v56 = vmul.f32 %v3739_v36, %v3995_v55  ;;  %v480_v55 = vmul.f32 %v3744_v40, %v3986_v62 }
 0x159   : > { %1212 = vperm.xlu1 %3004, %v3993_v32  }
 0x15a   : > { %v753_v0 = vadd.f32 %v689_v43, %v479_v17  ;;  %v754_v16 = vadd.f32 %v690_v56, %v480_v55  ;;  %v486_v17 = vmul.f32 %v3744_v40, %v360_v24 }
 0x15b   : > { %2134 = vperm.xlu0 %3017, %v3908_v22  }
 0x15c   : > { %v847_v54 = vpop.permute.xlu1 %846 }
 0x15d   : > { %404 = vperm.xlu1 %3004, %v266_v47   ;;  %v963_v59 = vmul.f32 %v3747_v12, %v847_v54  ;;  %v964_v23 = vmul.f32 %v3749_v20, %v847_v54  ;;  %v1168_v54 = vpop.permute.xlu0 %1167 }
 0x15f   : > { %2142 = vperm.xlu0 %3017, %v3956_v34   ;;  %v1028_v4 = vadd.f32 %v964_v23, %v754_v16 }
 0x160   : > { %v851_v53 = vpop.permute.xlu1 %850 }
 0x161   : > { %3005 = vset.pattern.permute.xlu1 %v4630_v11  ;;  %v965_v26 = vmul.f32 %v3747_v12, %v851_v53  ;;  %v966_v58 = vmul.f32 %v3749_v20, %v851_v53  ;;  %v1284_v27 = vadd.f32 %v1168_v54, %v1028_v4  ;;  %v370_v6 = vpop.permute.xlu0 %369 }
 0x162   : > { %620 = vperm.xlu1 %3005, %v266_v47  }
 0x163   : > { %2150 = vperm.xlu0 %3017, %v3993_v32   ;;  %v1029_v28 = vadd.f32 %v965_v26, %v755_v2 }
 0x165   : > { %v1163_v31 = vpop.permute.xlu1 %1162 }
 0x166   : > { %v1281_v39 = vadd.f32 %v1163_v31, %v1025_v50  ;;  %v1282_v18 = vadd.f32 %v1163_v31, %v1026_v57  ;;  %3006 = vset.pattern.permute.xlu1 %v4627_v10  ;;  %v1348_v31 = vmax.f32 %v1284_v27, 0.0 }
 0x167   : > { %894 = vperm.xlu1 %3006, %v266_v47   ;;  %2158 = vperm.xlu0 %3017, %v4027_v1   ;;  %v482_v47 = vmul.f32 %v3744_v40, %v350_v8  ;;  %v1027_v8 = vadd.f32 %v963_v59, %v753_v0 }
 0x168   : > { %v1345_v14 = vmax.f32 %v1281_v39, 0.0  ;;  %v1346_v63 = vmax.f32 %v1282_v18, 0.0 }
 0x169   : > { %v4030_v9 = vpop.permute.xlu1 %354  ;;  %v756_v61 = vadd.f32 %v692_v29, %v482_v47  ;;  %v1283_v3 = vadd.f32 %v1168_v54, %v1027_v8  ;;  %v695_v29 = vmul.f32 %v3737_v52, %v4654_v21  ;;  %v485_v47 = vmul.f32 %v3742_v5, %v360_v24 }
 0x16a   : > { %v1428_v25 = vpack.c.bf16 %v1346_v63, %v1344_v45  ;;  %v1427_v19 = vpack.c.bf16 %v1345_v14, %v1343_v49  ;;  %v3126_v63 = vld [vmem:[%s4551_s1 + $0xe8] sm:$0xff]  ;;  %v484_v43 = vmul.f32 %v3744_v40, %v4030_v9 }
 0x16b   : > { %898 = vperm.xlu1 %3006, %v3125_v41   ;;  %2166 = vperm.xlu0 %3017, %v4038_v51   ;;  %v1030_v35 = vadd.f32 %v966_v58, %v756_v61  ;;  %v1347_v39 = vmax.f32 %v1283_v3, 0.0  ;;  %v483_v41 = vmul.f32 %v3742_v5, %v4030_v9  ;;  %v759_v16 = vadd.f32 %v695_v29, %v485_v47  ;;  %v1178_v61 = vpop.permute.xlu0 %1177 }
 0x16c   : > { %1747 = vmatprep.subr.bf16.mxu0 %v1428_v25 }
 0x16d   : > { %1748 = vmatpush1.bf16.msra.mxu0 %v1427_v19  ;;  %v270_v19 = vld [vmem:[%s4551_s1 + $0xf0] sm:$0xff] }
 0x16e   : > { %v581_v7 = vpop.permute.xlu1 %580 }
 0x16f   : > { %3007 = vset.pattern.permute.xlu1 %v4632_v33  ;;  %2174 = vperm.xlu0 %3017, %v4045_v48   ;;  %v693_v49 = vmul.f32 %v3737_v52, %v581_v7  ;;  %v694_v25 = vmul.f32 %v3739_v36, %v581_v7  ;;  %v696_v7 = vmul.f32 %v3739_v36, %v4654_v21 }
 0x170   : > { %1222 = vperm.xlu1 %3007, %v4027_v1  }
 0x171   : > { %v757_v55 = vadd.f32 %v693_v49, %v483_v41  ;;  %v758_v59 = vadd.f32 %v694_v25, %v484_v43  ;;  %v760_v2 = vadd.f32 %v696_v7, %v486_v17  ;;  %v380_v43 = vpop.permute.xlu0 %379 }
 0x173   : > { %v855_v15 = vpop.permute.xlu1 %854  ;;  %2182 = vperm.xlu0 %3017, %v4653_v30  }
 0x174   : > { %414 = vperm.xlu1 %3007, %v268_v46   ;;  %v967_v56 = vmul.f32 %v3747_v12, %v855_v15 }
 0x176   : > { %v1031_v9 = vadd.f32 %v967_v56, %v757_v55  ;;  %v490_v56 = vmul.f32 %v3744_v40, %v370_v6 }
 0x177   : > { %v859_v62 = vpop.permute.xlu1 %858 }
 0x178   : > { %3008 = vset.pattern.permute.xlu1 %v4630_v11  ;;  %v969_v30 = vmul.f32 %v3747_v12, %v859_v62  ;;  %v1287_v58 = vadd.f32 %v1178_v61, %v1031_v9 }
 0x179   : > { %628 = vperm.xlu1 %3008, %v268_v46  }
 0x17a   : > { %v1033_v8 = vadd.f32 %v969_v30, %v759_v16  ;;  %v1351_v3 = vmax.f32 %v1287_v58, 0.0 }
 0x17c   : > { %v1173_v37 = vpop.permute.xlu1 %1172 }
 0x17d   : > { %v1285_v50 = vadd.f32 %v1173_v37, %v1029_v28  ;;  %v1286_v57 = vadd.f32 %v1173_v37, %v1030_v35  ;;  %3009 = vset.pattern.permute.xlu1 %v4627_v10 }
 0x17e   : > { %902 = vperm.xlu1 %3009, %v268_v46   ;;  %v968_v46 = vmul.f32 %v3749_v20, %v855_v15  ;;  %v970_v15 = vmul.f32 %v3749_v20, %v859_v62 }
 0x17f   : > { %v1349_v60 = vmax.f32 %v1285_v50, 0.0  ;;  %v1350_v44 = vmax.f32 %v1286_v57, 0.0 }
 0x180   : > { %v365_v53 = vpop.permute.xlu1 %364  ;;  %v1032_v23 = vadd.f32 %v968_v46, %v758_v59  ;;  %v1034_v4 = vadd.f32 %v970_v15, %v760_v2  ;;  %v1188_v59 = vpop.permute.xlu0 %1187  ;;  %v3023_v15 = vld [vmem:[%s4552_s2 + $0x4] ss:$8 sps:$4 sm:$0xff]  }
 0x181   : > { %v1430_v18 = vpack.c.bf16 %v1350_v44, %v1348_v31  ;;  %v1429_v14 = vpack.c.bf16 %v1349_v60, %v1347_v39  ;;  %v3127_v60 = vld [vmem:[%s4551_s1 + $0xf8] sm:$0xff]  ;;  %1767 = vmatprep.mubr.bf16.mxu0 %v3023_v15 }
 0x182   : > { %906 = vperm.xlu1 %3009, %v3126_v63   ;;  %v1288_v26 = vadd.f32 %v1178_v61, %v1032_v23 }
 0x183   : > { %1749 = vmatprep.subr.bf16.mxu0 %v1430_v18  ;;  %v487_v18 = vmul.f32 %v3742_v5, %v365_v53 }
 0x184   : > { %1750 = vmatpush1.bf16.msra.mxu0 %v1429_v14  ;;  %v1352_v62 = vmax.f32 %v1288_v26, 0.0  ;;  %v488_v14 = vmul.f32 %v3744_v40, %v365_v53 }
 0x185   : > { %v589_v45 = vpop.permute.xlu1 %588 }
 0x186   : > { %3010 = vset.pattern.permute.xlu1 %v4632_v33  ;;  %v697_v31 = vmul.f32 %v3737_v52, %v589_v45  ;;  %v698_v39 = vmul.f32 %v3739_v36, %v589_v45  ;;  %v489_v45 = vmul.f32 %v3742_v5, %v370_v6 }
 0x187   : > { %1232 = vperm.xlu1 %3010, %v4038_v51  }
 0x188   : > { %v761_v46 = vadd.f32 %v697_v31, %v487_v18  ;;  %v762_v53 = vadd.f32 %v698_v39, %v488_v14  ;;  %v4656_v14 = vld [vmem:[#allocation26_spill] sm:$0xff] }
 0x18a   : > { %v863_v13 = vpop.permute.xlu1 %862 }
 0x18b   : > { %424 = vperm.xlu1 %3010, %v270_v19   ;;  %v971_v63 = vmul.f32 %v3747_v12, %v863_v13  ;;  %v972_v49 = vmul.f32 %v3749_v20, %v863_v13 }
 0x18d   : > { %v1035_v21 = vadd.f32 %v971_v63, %v761_v46  ;;  %v1036_v29 = vadd.f32 %v972_v49, %v762_v53  ;;  %v703_v63 = vmul.f32 %v3737_v52, %v4656_v14  ;;  %v390_v49 = vpop.permute.xlu0 %389 }
 0x18e   : > { %v867_v0 = vpop.permute.xlu1 %866 }
 0x18f   : > { %3011 = vset.pattern.permute.xlu1 %v4630_v11  ;;  %v973_v13 = vmul.f32 %v3747_v12, %v867_v0  ;;  %v974_v7 = vmul.f32 %v3749_v20, %v867_v0  ;;  %v1292_v23 = vadd.f32 %v1188_v59, %v1036_v29  ;;  %v1291_v30 = vadd.f32 %v1188_v59, %v1035_v21 }
 0x190   : > { %636 = vperm.xlu1 %3011, %v270_v19  }
 0x191   : > { %v1355_v26 = vmax.f32 %v1291_v30, 0.0 }
 0x193   : > { %v1183_v24 = vpop.permute.xlu1 %1182 }
 0x194   : > { %v1289_v54 = vadd.f32 %v1183_v24, %v1033_v8  ;;  %v1290_v28 = vadd.f32 %v1183_v24, %v1034_v4  ;;  %3013 = vset.pattern.permute.xlu1 %v4627_v10  ;;  %v1356_v4 = vmax.f32 %v1292_v23, 0.0 }
 0x195   : > { %910 = vperm.xlu1 %3013, %v270_v19   ;;  %v4655_v19 = vld [vmem:[#allocation25_spill] sm:$0xff] }
 0x196   : > { %v1353_v35 = vmax.f32 %v1289_v54, 0.0  ;;  %v1354_v27 = vmax.f32 %v1290_v28, 0.0  ;;  %v699_v41 = vmul.f32 %v3737_v52, %v4655_v19  ;;  %v3130_v28 = vld [vmem:[%s4554_s4 + $0x18] sm:$0xff] }
 0x197   : > { %v4099_v37 = vpop.permute.xlu1 %374 }
 0x198   : > { %v1432_v50 = vpack.c.bf16 %v1354_v27, %v1352_v62  ;;  %v1431_v57 = vpack.c.bf16 %v1353_v35, %v1351_v3  ;;  %v763_v17 = vadd.f32 %v699_v41, %v489_v45  ;;  %v3131_v27 = vld [vmem:[%s4554_s4 + $0x28] sm:$0xff]  ;;  %v494_v41 = vmul.f32 %v3744_v40, %v380_v43 }
 0x199   : > { %914 = vperm.xlu1 %3013, %v3127_v60   ;;  %v492_v60 = vmul.f32 %v3744_v40, %v4099_v37 }
 0x19a   : > { %1751 = vmatprep.subr.bf16.mxu0 %v1432_v50  ;;  %v1037_v6 = vadd.f32 %v973_v13, %v763_v17  ;;  %v3132_v50 = vld [vmem:[%s4554_s4 + $0x38] sm:$0xff] }
 0x19b   : > { %1752 = vmatpush1.bf16.msra.mxu0 %v1431_v57  ;;  %v491_v57 = vmul.f32 %v3742_v5, %v4099_v37  ;;  %v3133_v37 = vld [vmem:[%s4554_s4 + $0x48] sm:$0xff] }
 0x19c   : > { %v597_v44 = vpop.permute.xlu1 %596 }
 0x19d   : > { %3014 = vset.pattern.permute.xlu1 %v4632_v33  ;;  %v700_v33 = vmul.f32 %v3739_v36, %v4655_v19  ;;  %v701_v62 = vmul.f32 %v3737_v52, %v597_v44  ;;  %v702_v3 = vmul.f32 %v3739_v36, %v597_v44  ;;  %v704_v44 = vmul.f32 %v3739_v36, %v4656_v14 }
 0x19e   : > { %1242 = vperm.xlu1 %3014, %v4045_v48   ;;  %v493_v19 = vmul.f32 %v3742_v5, %v380_v43  ;;  %v3134_v43 = vld [vmem:[%s4554_s4 + $0x58] sm:$0xff] }
 0x19f   : > { %v764_v55 = vadd.f32 %v700_v33, %v490_v56  ;;  %v765_v33 = vadd.f32 %v701_v62, %v491_v57  ;;  %v766_v45 = vadd.f32 %v702_v3, %v492_v60  ;;  %v768_v13 = vadd.f32 %v704_v44, %v494_v41  ;;  %v4657_v57 = vld [vmem:[#allocation29_spill] sm:$0xff] }
 0x1a0   : > { %v767_v29 = vadd.f32 %v703_v63, %v493_v19  ;;  %v708_v60 = vmul.f32 %v3739_v36, %v4657_v57 }
 0x1a1   : > { %v871_v25 = vpop.permute.xlu1 %870  ;;  %v1038_v9 = vadd.f32 %v974_v7, %v764_v55  ;;  %v1198_v7 = vpop.permute.xlu0 %1197 }
 0x1a2   : > { %1247 = vperm.xlu1 %3014, %v3940_v38   ;;  %v3128_v38 = vld [vmem:[%s4554_s4] sm:$0xff]  ;;  %v975_v31 = vmul.f32 %v3747_v12, %v871_v25  ;;  %v976_v39 = vmul.f32 %v3749_v20, %v871_v25 }
 0x1a4   : > { %v1039_v25 = vadd.f32 %v975_v31, %v765_v33  ;;  %v1040_v56 = vadd.f32 %v976_v39, %v766_v45  ;;  %v497_v31 = vmul.f32 %v3742_v5, %v390_v49  ;;  %v498_v39 = vmul.f32 %v3744_v40, %v390_v49 }
 0x1a5   : > { %v875_v47 = vpop.permute.xlu1 %874 }
 0x1a6   : > { %3015 = vset.pattern.permute.xlu1 %v4630_v11  ;;  %v4131_v11 = vld [vmem:[%s4554_s4 + $0x10] sm:$0xff]  ;;  %v977_v46 = vmul.f32 %v3747_v12, %v875_v47  ;;  %v978_v53 = vmul.f32 %v3749_v20, %v875_v47  ;;  %v1295_v59 = vadd.f32 %v1198_v7, %v1039_v25  ;;  %v3135_v47 = vld [vmem:[%s4554_s4 + $0x68] sm:$0xff]  ;;  %v772_v33 = vadd.f32 %v708_v60, %v498_v39 }
 0x1a7   : > { %1448 = vperm.xlu1 %3015, %v3128_v38   ;;  %v1296_v38 = vadd.f32 %v1198_v7, %v1040_v56 }
 0x1a8   : > { %v1041_v17 = vadd.f32 %v977_v46, %v767_v29  ;;  %v1042_v55 = vadd.f32 %v978_v53, %v768_v13 }
 0x1aa   : > { %v1193_v0 = vpop.permute.xlu1 %1192 }
 0x1ab   : > { %v1293_v16 = vadd.f32 %v1193_v0, %v1037_v6  ;;  %v1294_v2 = vadd.f32 %v1193_v0, %v1038_v9  ;;  %1456 = vperm.xlu1 %3015, %v4131_v11   ;;  %v1360_v0 = vmax.f32 %v1296_v38, 0.0 }
 0x1ad   : > { %v1357_v61 = vmax.f32 %v1293_v16, 0.0  ;;  %v1358_v8 = vmax.f32 %v1294_v2, 0.0  ;;  %v1359_v16 = vmax.f32 %v1295_v59, 0.0 }
 0x1ae   : > { %v4134_v58 = vpop.permute.xlu1 %384 }
 0x1af   : > { %v1434_v24 = vpack.c.bf16 %v1358_v8, %v1356_v4  ;;  %v1433_v54 = vpack.c.bf16 %v1357_v61, %v1355_v26  ;;  %1460 = vperm.xlu1 %3015, %v3130_v28   ;;  %v3136_v4 = vld [vmem:[%s4554_s4 + $0x78] sm:$0xff]  ;;  %v495_v28 = vmul.f32 %v3742_v5, %v4134_v58 }
 0x1b1   : > { %1753 = vmatprep.subr.bf16.mxu0 %v1434_v24 }
 0x1b2   : > { %1754 = vmatpush1.bf16.msra.mxu0 %v1433_v54 }
 0x1b3   : > { %v605_v35 = vpop.permute.xlu1 %604  ;;  %1468 = vperm.xlu1 %3015, %v3131_v27   ;;  %v496_v27 = vmul.f32 %v3744_v40, %v4134_v58 }
 0x1b4   : > { %v705_v24 = vmul.f32 %v3737_v52, %v605_v35  ;;  %v706_v54 = vmul.f32 %v3739_v36, %v605_v35  ;;  %v400_v35 = vpop.permute.xlu0 %399 }
 0x1b6   : > { %v769_v14 = vadd.f32 %v705_v24, %v495_v28  ;;  %v770_v58 = vadd.f32 %v706_v54, %v496_v27 }
 0x1b7   : > { %1476 = vperm.xlu1 %3015, %v3132_v50  }
 0x1b8   : > { %v879_v18 = vpop.permute.xlu1 %878  ;;  %v1208_v45 = vpop.permute.xlu0 %1207 }
 0x1b9   : > { %v979_v62 = vmul.f32 %v3747_v12, %v879_v18  ;;  %v980_v3 = vmul.f32 %v3749_v20, %v879_v18 }
 0x1bb   : > { %1484 = vperm.xlu1 %3015, %v3133_v37   ;;  %v1043_v63 = vadd.f32 %v979_v62, %v769_v14  ;;  %v1044_v44 = vadd.f32 %v980_v3, %v770_v58  ;;  %v3138_v3 = vld [vmem:[%s4554_s4 + $0x8] sm:$0xff] }
 0x1bc   : > { %v883_v21 = vpop.permute.xlu1 %882 }
 0x1bd   : > { %v981_v18 = vmul.f32 %v3747_v12, %v883_v21  ;;  %v982_v19 = vmul.f32 %v3749_v20, %v883_v21  ;;  %v1300_v56 = vadd.f32 %v1208_v45, %v1044_v44  ;;  %v1299_v46 = vadd.f32 %v1208_v45, %v1043_v63 }
 0x1bf   : > { %1492 = vperm.xlu1 %3015, %v3134_v43   ;;  %v1046_v25 = vadd.f32 %v982_v19, %v772_v33  ;;  %v1364_v43 = vmax.f32 %v1300_v56, 0.0 }
 0x1c1   : > { %v1203_v6 = vpop.permute.xlu1 %1202 }
 0x1c2   : > { %v1297_v9 = vadd.f32 %v1203_v6, %v1041_v17  ;;  %v1298_v23 = vadd.f32 %v1203_v6, %v1042_v55  ;;  %v1363_v17 = vmax.f32 %v1299_v46, 0.0 }
 0x1c3   : > { %1500 = vperm.xlu1 %3015, %v3135_v47  }
 0x1c4   : > { %v1361_v30 = vmax.f32 %v1297_v9, 0.0  ;;  %v1362_v15 = vmax.f32 %v1298_v23, 0.0 }
 0x1c5   : > { %v395_v2 = vpop.permute.xlu1 %394 }
 0x1c6   : > { %v1436_v61 = vpack.c.bf16 %v1362_v15, %v1360_v0  ;;  %v1435_v8 = vpack.c.bf16 %v1361_v30, %v1359_v16  ;;  %v499_v6 = vmul.f32 %v3742_v5, %v395_v2  ;;  %v500_v9 = vmul.f32 %v3744_v40, %v395_v2  ;;  %v4658_v30 = vld [vmem:[#allocation30_spill] sm:$0xff]  ;;  %v3137_v0 = vld [vmem:[%s4554_s4 + $0xf8] sm:$0xff] }
 0x1c7   : > { %1508 = vperm.xlu1 %3015, %v3136_v4   ;;  %v712_v15 = vmul.f32 %v3739_v36, %v4658_v30  ;;  %v501_v16 = vmul.f32 %v3742_v5, %v400_v35  ;;  %v502_v2 = vmul.f32 %v3744_v40, %v400_v35 }
 0x1c8   : > { %1755 = vmatprep.subr.bf16.mxu0 %v1436_v61 }
 0x1c9   : > { %1756 = vmatpush1.bf16.msra.mxu0 %v1435_v8  ;;  %v776_v62 = vadd.f32 %v712_v15, %v502_v2  ;;  %v3143_v15 = vld [vmem:[%s4554_s4 + $0x60] sm:$0xff] }
 0x1ca   : > { %v613_v26 = vpop.permute.xlu1 %612 }
 0x1cb   : > { %1516 = vperm.xlu1 %3015, %v3859_v42   ;;  %v707_v42 = vmul.f32 %v3737_v52, %v4657_v57  ;;  %v710_v59 = vmul.f32 %v3739_v36, %v613_v26 }
 0x1cd   : > { %v771_v41 = vadd.f32 %v707_v42, %v497_v31  ;;  %v774_v8 = vadd.f32 %v710_v59, %v500_v9 }
 0x1cf   : > { %v887_v50 = vpop.permute.xlu1 %886  ;;  %1524 = vperm.xlu1 %3015, %v3908_v22   ;;  %v1045_v37 = vadd.f32 %v981_v18, %v771_v41  ;;  %v3139_v41 = vld [vmem:[%s4554_s4 + $0x20] sm:$0xff] }
 0x1d0   : > { %v984_v23 = vmul.f32 %v3749_v20, %v887_v50 }
 0x1d3   : > { %v891_v22 = vpop.permute.xlu1 %890  ;;  %1532 = vperm.xlu1 %3015, %v3956_v34  }
 0x1d4   : > { %v985_v24 = vmul.f32 %v3747_v12, %v891_v22  ;;  %v986_v54 = vmul.f32 %v3749_v20, %v891_v22 }
 0x1d6   : > { %v1050_v42 = vadd.f32 %v986_v54, %v776_v62 }
 0x1d7   : > { %1540 = vperm.xlu1 %3015, %v3993_v32   ;;  %v709_v32 = vmul.f32 %v3737_v52, %v613_v26  ;;  %v1048_v26 = vadd.f32 %v984_v23, %v774_v8 }
 0x1d8   : > { %v1213_v49 = vpop.permute.xlu1 %1212 }
 0x1d9   : > { %v1301_v53 = vadd.f32 %v1213_v49, %v1045_v37  ;;  %v1302_v29 = vadd.f32 %v1213_v49, %v1046_v25  ;;  %v773_v61 = vadd.f32 %v709_v32, %v499_v6  ;;  %v3141_v25 = vld [vmem:[%s4554_s4 + $0x40] sm:$0xff] }
 0x1db   : > { %v1365_v13 = vmax.f32 %v1301_v53, 0.0  ;;  %v1366_v7 = vmax.f32 %v1302_v29, 0.0  ;;  %1548 = vperm.xlu1 %3015, %v4027_v1   ;;  %v983_v1 = vmul.f32 %v3747_v12, %v887_v50 }
 0x1dc   : > { %v405_v21 = vpop.permute.xlu1 %404 }
 0x1dd   : > { %v1438_v34 = vpack.c.bf16 %v1366_v7, %v1364_v43  ;;  %v1437_v55 = vpack.c.bf16 %v1365_v13, %v1363_v17  ;;  %v1047_v4 = vadd.f32 %v983_v1, %v773_v61  ;;  %v503_v56 = vmul.f32 %v3742_v5, %v405_v21  ;;  %v4659_v13 = vld [vmem:[#allocation32_spill] sm:$0xff] }
 0x1de   : > { %v504_v46 = vmul.f32 %v3744_v40, %v405_v21  ;;  %v715_v7 = vmul.f32 %v3737_v52, %v4659_v13  ;;  %v716_v43 = vmul.f32 %v3739_v36, %v4659_v13  ;;  %v3142_v21 = vld [vmem:[%s4554_s4 + $0x50] sm:$0xff] }
 0x1df   : > { %1757 = vmatprep.subr.bf16.mxu0 %v1438_v34  ;;  %1556 = vperm.xlu1 %3015, %v4038_v51   ;;  %v711_v51 = vmul.f32 %v3737_v52, %v4658_v30 }
 0x1e0   : > { %1758 = vmatpush1.bf16.msra.mxu0 %v1437_v55 }
 0x1e1   : > { %v621_v38 = vpop.permute.xlu1 %620  ;;  %v775_v27 = vadd.f32 %v711_v51, %v501_v16 }
 0x1e2   : > { %v713_v45 = vmul.f32 %v3737_v52, %v621_v38  ;;  %v714_v37 = vmul.f32 %v3739_v36, %v621_v38 }
 0x1e3   : > { %1564 = vperm.xlu1 %3015, %v4045_v48   ;;  %v410_v48 = vpop.permute.xlu0 %409  ;;  %v1049_v57 = vadd.f32 %v985_v24, %v775_v27 }
 0x1e4   : > { %v505_v34 = vmul.f32 %v3742_v5, %v410_v48  ;;  %v506_v55 = vmul.f32 %v3744_v40, %v410_v48  ;;  %v777_v38 = vadd.f32 %v713_v45, %v503_v56  ;;  %v778_v32 = vadd.f32 %v714_v37, %v504_v46 }
 0x1e6   : > { %v895_v47 = vpop.permute.xlu1 %894  ;;  %v780_v30 = vadd.f32 %v716_v43, %v506_v55 }
 0x1e7   : > { %1572 = vperm.xlu1 %3015, %v3137_v0   ;;  %v1218_v50 = vpop.permute.xlu0 %1217  ;;  %v987_v49 = vmul.f32 %v3747_v12, %v895_v47  ;;  %v988_v53 = vmul.f32 %v3749_v20, %v895_v47  ;;  %v779_v47 = vadd.f32 %v715_v7, %v505_v34 }
 0x1e8   : > { %v1304_v60 = vadd.f32 %v1218_v50, %v1048_v26  ;;  %v1303_v35 = vadd.f32 %v1218_v50, %v1047_v4  ;;  %v3144_v26 = vld [vmem:[%s4554_s4 + $0x70] sm:$0xff] }
 0x1e9   : > { %v1051_v59 = vadd.f32 %v987_v49, %v777_v38  ;;  %v1052_v6 = vadd.f32 %v988_v53, %v778_v32  ;;  %v3148_v38 = vld [vmem:[%s4554_s4 + $0xb0] sm:$0xff] }
 0x1ea   : > { %v899_v28 = vpop.permute.xlu1 %898  ;;  %v1367_v44 = vmax.f32 %v1303_v35, 0.0 }
 0x1eb   : > { %3018 = vset.pattern.permute.xlu1 %v4627_v10  ;;  %v1368_v10 = vmax.f32 %v1304_v60, 0.0  ;;  %v420_v17 = vpop.permute.xlu0 %419  ;;  %v989_v9 = vmul.f32 %v3747_v12, %v899_v28  ;;  %v990_v1 = vmul.f32 %v3749_v20, %v899_v28 }
 0x1ec   : > { %2062 = vperm.xlu1 %3018, %v3138_v3  }
 0x1ed   : > { %v1053_v16 = vadd.f32 %v989_v9, %v779_v47  ;;  %v1054_v2 = vadd.f32 %v990_v1, %v780_v30 }
 0x1ef   : > { %v1223_v31 = vpop.permute.xlu1 %1222  ;;  %v1228_v51 = vpop.permute.xlu0 %1227 }
 0x1f0   : > { %v1305_v39 = vadd.f32 %v1223_v31, %v1049_v57  ;;  %v1306_v14 = vadd.f32 %v1223_v31, %v1050_v42  ;;  %2066 = vperm.xlu1 %3018, %v4131_v11   ;;  %v3140_v11 = vld [vmem:[%s4554_s4 + $0x30] sm:$0xff]  ;;  %v1307_v48 = vadd.f32 %v1228_v51, %v1051_v59  ;;  %v1308_v0 = vadd.f32 %v1228_v51, %v1052_v6  ;;  %v3145_v57 = vld [vmem:[%s4554_s4 + $0x80] sm:$0xff] }
 0x1f1   : > { %v3146_v31 = vld [vmem:[%s4554_s4 + $0x90] sm:$0xff] }
 0x1f2   : > { %v1369_v58 = vmax.f32 %v1305_v39, 0.0  ;;  %v1370_v63 = vmax.f32 %v1306_v14, 0.0  ;;  %v1372_v28 = vmax.f32 %v1308_v0, 0.0  ;;  %v1371_v27 = vmax.f32 %v1307_v48, 0.0 }
 0x1f3   : > { %v4218_v18 = vpop.permute.xlu1 %414 }
 0x1f4   : > { %v1440_v19 = vpack.c.bf16 %v1370_v63, %v1368_v10  ;;  %v1439_v22 = vpack.c.bf16 %v1369_v58, %v1367_v44  ;;  %2074 = vperm.xlu1 %3018, %v3139_v41   ;;  %v507_v39 = vmul.f32 %v3742_v5, %v4218_v18  ;;  %v508_v14 = vmul.f32 %v3744_v40, %v4218_v18  ;;  %v4660_v10 = vld [vmem:[#allocation34_spill] sm:$0xff] }
 0x1f5   : > { %v719_v44 = vmul.f32 %v3737_v52, %v4660_v10  ;;  %v509_v41 = vmul.f32 %v3742_v5, %v420_v17  ;;  %v3147_v18 = vld [vmem:[%s4554_s4 + $0xa0] sm:$0xff] }
 0x1f6   : > { %1759 = vmatprep.subr.bf16.mxu0 %v1440_v19  ;;  %v720_v19 = vmul.f32 %v3739_v36, %v4660_v10 }
 0x1f7   : > { %1760 = vmatpush1.bf16.msra.mxu0 %v1439_v22  ;;  %v430_v22 = vpop.permute.xlu0 %429  ;;  %v783_v7 = vadd.f32 %v719_v44, %v509_v41  ;;  %v3151_v44 = vld [vmem:[%s4554_s4 + $0xe0] sm:$0xff] }
 0x1f8   : > { %v629_v33 = vpop.permute.xlu1 %628  ;;  %2082 = vperm.xlu1 %3018, %v3140_v11   ;;  %v513_v49 = vmul.f32 %v3742_v5, %v430_v22  ;;  %v514_v53 = vmul.f32 %v3744_v40, %v430_v22  ;;  %v3021_v41 = vld [vmem:[%s4552_s2] ss:$8 sps:$4 sm:$0xff]  }
 0x1f9   : > { %v717_v60 = vmul.f32 %v3737_v52, %v629_v33  ;;  %v718_v35 = vmul.f32 %v3739_v36, %v629_v33  ;;  %v510_v33 = vmul.f32 %v3744_v40, %v420_v17 }
 0x1fb   : > { %v781_v11 = vadd.f32 %v717_v60, %v507_v39  ;;  %v782_v45 = vadd.f32 %v718_v35, %v508_v14  ;;  %v784_v43 = vadd.f32 %v720_v19, %v510_v33  ;;  %v1238_v32 = vpop.permute.xlu0 %1237  ;;  %v3152_v33 = vld [vmem:[%s4554_s4 + $0xf0] sm:$0xff] }
 0x1fc   : > { %2090 = vperm.xlu1 %3018, %v3141_v25   ;;  %v4661_v25 = vld [vmem:[#allocation35_spill] sm:$0xff] }
 0x1fd   : > { %v903_v29 = vpop.permute.xlu1 %902  ;;  %v723_v56 = vmul.f32 %v3737_v52, %v4661_v25  ;;  %v724_v46 = vmul.f32 %v3739_v36, %v4661_v25  ;;  %v3030_v25 = vld [vmem:[%s4552_s2 + $0x34] ss:$8 sps:$4 sm:$0xff]  }
 0x1fe   : > { %v991_v58 = vmul.f32 %v3747_v12, %v903_v29  ;;  %v992_v63 = vmul.f32 %v3749_v20, %v903_v29 }
 0x1ff   : > { %v787_v1 = vadd.f32 %v723_v56, %v513_v49  ;;  %v788_v47 = vadd.f32 %v724_v46, %v514_v53  ;;  %v3032_v56 = vld [vmem:[%s4552_s2 + $0x30] ss:$8 sps:$4 sm:$0xff]   ;;  %v3033_v46 = vld [vmem:[%s4552_s2 + $0x44] ss:$8 sps:$4 sm:$0xff]   ;;  %v3035_v49 = vld [vmem:[%s4552_s2 + $0x40] ss:$8 sps:$4 sm:$0xff]  }
 0x200   : > { %2098 = vperm.xlu1 %3018, %v3142_v21   ;;  %v1055_v29 = vadd.f32 %v991_v58, %v781_v11  ;;  %v1056_v13 = vadd.f32 %v992_v63, %v782_v45  ;;  %v3024_v11 = vld [vmem:[%s4552_s2 + $0x14] ss:$8 sps:$4 sm:$0xff]   ;;  %v3026_v45 = vld [vmem:[%s4552_s2 + $0x10] ss:$8 sps:$4 sm:$0xff]  }
 0x201   : > { %v907_v23 = vpop.permute.xlu1 %906  ;;  %v3036_v53 = vld [vmem:[%s4552_s2 + $0x54] ss:$8 sps:$4 sm:$0xff]  }
 0x202   : > { %v993_v17 = vmul.f32 %v3747_v12, %v907_v23  ;;  %v994_v34 = vmul.f32 %v3749_v20, %v907_v23  ;;  %v1311_v30 = vadd.f32 %v1238_v32, %v1055_v29  ;;  %v1312_v51 = vadd.f32 %v1238_v32, %v1056_v13  ;;  %v3038_v29 = vld [vmem:[%s4552_s2 + $0x50] ss:$8 sps:$4 sm:$0xff]   ;;  %v3039_v13 = vld [vmem:[%s4552_s2 + $0x64] ss:$8 sps:$4 sm:$0xff]  }
 0x203   : > { %v3050_v32 = vld [vmem:[%s4552_s2 + $0x90] ss:$8 sps:$4 sm:$0xff]  }
 0x204   : > { %2106 = vperm.xlu1 %3018, %v3143_v15  }
 0x206   : > { %v1233_v61 = vpop.permute.xlu1 %1232 }
 0x207   : > { %v1309_v8 = vadd.f32 %v1233_v61, %v1053_v16  ;;  %v1310_v4 = vadd.f32 %v1233_v61, %v1054_v2  ;;  %v1057_v2 = vadd.f32 %v993_v17, %v783_v7  ;;  %v3149_v61 = vld [vmem:[%s4554_s4 + $0xc0] sm:$0xff]  ;;  %v3044_v17 = vld [vmem:[%s4552_s2 + $0x70] ss:$8 sps:$4 sm:$0xff]  }
 0x208   : > { %2114 = vperm.xlu1 %3018, %v3144_v26   ;;  %v3041_v7 = vld [vmem:[%s4552_s2 + $0x60] ss:$8 sps:$4 sm:$0xff]  }
 0x209   : > { %v1373_v24 = vmax.f32 %v1309_v8, 0.0  ;;  %v1374_v54 = vmax.f32 %v1310_v4, 0.0 }
 0x20a   : > { %v425_v62 = vpop.permute.xlu1 %424 }
 0x20b   : > { %v1442_v3 = vpack.c.bf16 %v1374_v54, %v1372_v28  ;;  %v1441_v50 = vpack.c.bf16 %v1373_v24, %v1371_v27  ;;  %v511_v23 = vmul.f32 %v3742_v5, %v425_v62  ;;  %v512_v15 = vmul.f32 %v3744_v40, %v425_v62  ;;  %v1253_v54 = vpop.permute.xlu0 %1252 }
 0x20c   : > { %2122 = vperm.xlu1 %3018, %v3145_v57   ;;  %v1375_v27 = vmax.f32 %v1311_v30, 0.0  ;;  %v3150_v57 = vld [vmem:[%s4554_s4 + $0xd0] sm:$0xff] }
 0x20d   : > { %1761 = vmatprep.subr.bf16.mxu0 %v1442_v3  ;;  %v3060_v30 = vld [vmem:[%s4552_s2 + $0xd4] ss:$8 sps:$4 sm:$0xff]  }
 0x20e   : > { %1762 = vmatpush1.bf16.msra.mxu0 %v1441_v50 }
 0x20f   : > { %v637_v42 = vpop.permute.xlu1 %636 }
 0x210   : > { %2130 = vperm.xlu1 %3018, %v3146_v31   ;;  %v721_v21 = vmul.f32 %v3737_v52, %v637_v42  ;;  %v722_v59 = vmul.f32 %v3739_v36, %v637_v42  ;;  %v1058_v36 = vadd.f32 %v994_v34, %v784_v43  ;;  %v3042_v43 = vld [vmem:[%s4552_s2 + $0x74] ss:$8 sps:$4 sm:$0xff]   ;;  %v3045_v34 = vld [vmem:[%s4552_s2 + $0x84] ss:$8 sps:$4 sm:$0xff]  }
 0x212   : > { %v785_v8 = vadd.f32 %v721_v21, %v511_v23  ;;  %v786_v4 = vadd.f32 %v722_v59, %v512_v15  ;;  %v3051_v21 = vld [vmem:[%s4552_s2 + $0xa4] ss:$8 sps:$4 sm:$0xff]   ;;  %v3053_v59 = vld [vmem:[%s4552_s2 + $0xa0] ss:$8 sps:$4 sm:$0xff]  }
 0x213   : > { %v3063_v23 = vld [vmem:[%s4552_s2 + $0xe4] ss:$8 sps:$4 sm:$0xff]   ;;  %v3065_v15 = vld [vmem:[%s4552_s2 + $0xe0] ss:$8 sps:$4 sm:$0xff]  }
 0x214   : > { %v911_v37 = vpop.permute.xlu1 %910  ;;  %2138 = vperm.xlu1 %3018, %v3147_v18   ;;  %v3029_v18 = vld [vmem:[%s4552_s2 + $0x20] ss:$8 sps:$4 sm:$0xff]  }
 0x215   : > { %v995_v48 = vmul.f32 %v3747_v12, %v911_v37  ;;  %v996_v0 = vmul.f32 %v3749_v20, %v911_v37  ;;  %v3027_v37 = vld [vmem:[%s4552_s2 + $0x24] ss:$8 sps:$4 sm:$0xff]  }
 0x217   : > { %v1059_v40 = vadd.f32 %v995_v48, %v785_v8  ;;  %v1060_v28 = vadd.f32 %v996_v0, %v786_v4  ;;  %v3066_v48 = vld [vmem:[%s4552_s2 + $0xf4] ss:$8 sps:$4 sm:$0xff]   ;;  %v3068_v0 = vld [vmem:[%s4552_s2 + $0xf0] ss:$8 sps:$4 sm:$0xff]  }
 0x218   : > { %v915_v55 = vpop.permute.xlu1 %914  ;;  %2146 = vperm.xlu1 %3018, %v3148_v38   ;;  %v3048_v38 = vld [vmem:[%s4552_s2 + $0x94] ss:$8 sps:$4 sm:$0xff]  }
 0x219   : > { %v997_v6 = vmul.f32 %v3747_v12, %v915_v55  ;;  %v998_v9 = vmul.f32 %v3749_v20, %v915_v55  ;;  %v1376_v12 = vmax.f32 %v1312_v51, 0.0  ;;  %v3047_v55 = vld [vmem:[%s4552_s2 + $0x80] ss:$8 sps:$4 sm:$0xff]   ;;  %v3062_v51 = vld [vmem:[%s4552_s2 + $0xd0] ss:$8 sps:$4 sm:$0xff]  }
 0x21b   : > { %v1061_v16 = vadd.f32 %v997_v6, %v787_v1  ;;  %v1062_v52 = vadd.f32 %v998_v9, %v788_v47  ;;  %v3054_v6 = vld [vmem:[%s4552_s2 + $0xb4] ss:$8 sps:$4 sm:$0xff]   ;;  %v3056_v9 = vld [vmem:[%s4552_s2 + $0xb0] ss:$8 sps:$4 sm:$0xff]   ;;  %v3057_v1 = vld [vmem:[%s4552_s2 + $0xc4] ss:$8 sps:$4 sm:$0xff]  }
 0x21c   : > { %2154 = vperm.xlu1 %3018, %v3149_v61   ;;  %v3059_v47 = vld [vmem:[%s4552_s2 + $0xc0] ss:$8 sps:$4 sm:$0xff]  }
 0x21d   : > { %v1243_v26 = vpop.permute.xlu1 %1242  ;;  %v1317_v20 = vadd.f32 %v1253_v54, %v1061_v16  ;;  %v1318_v62 = vadd.f32 %v1253_v54, %v1062_v52 }
 0x21e   : > { %v1313_v24 = vadd.f32 %v1243_v26, %v1057_v2  ;;  %v1314_v5 = vadd.f32 %v1243_v26, %v1058_v36  ;;  %v1453_v2 = vpop.permute.xlu0 %1452 }
 0x21f   : > { %v1382_v63 = vmax.f32 %v1318_v62, 0.0  ;;  %v1381_v10 = vmax.f32 %v1317_v20, 0.0 }
 0x220   : > { %v1377_v3 = vmax.f32 %v1313_v24, 0.0  ;;  %v1378_v50 = vmax.f32 %v1314_v5, 0.0  ;;  %2162 = vperm.xlu1 %3018, %v3150_v57   ;;  %v3071_v5 = vld [vmem:[%s4552_s2 + $0x104] ss:$8 sps:$4 sm:$0xff]  }
 0x221   : > { %v1248_v42 = vpop.permute.xlu1 %1247  ;;  %2377 = vmatprep.mubr.bf16.mxu1 %v3071_v5 }
 0x222   : > { %v1315_v60 = vadd.f32 %v1248_v42, %v1059_v40  ;;  %v1316_v35 = vadd.f32 %v1248_v42, %v1060_v28  ;;  %v1444_v31 = vpack.c.bf16 %v1378_v50, %v1376_v12  ;;  %v1443_v39 = vpack.c.bf16 %v1377_v3, %v1375_v27 }
 0x224   : > { %v1379_v14 = vmax.f32 %v1315_v60, 0.0  ;;  %v1380_v58 = vmax.f32 %v1316_v35, 0.0  ;;  %1763 = vmatprep.subr.bf16.mxu0 %v1444_v31  ;;  %2170 = vperm.xlu1 %3018, %v3151_v44  }
 0x225   : > { %1764 = vmatpush1.bf16.msra.mxu0 %v1443_v39 }
 0x226   : > { %v1446_v19 = vpack.c.bf16 %v1382_v63, %v1380_v58  ;;  %v1445_v22 = vpack.c.bf16 %v1381_v10, %v1379_v14  ;;  %v1449_v16 = vpop.permute.xlu1 %1448 }
 0x228   : > { %1765 = vmatprep.subr.bf16.mxu0 %v1446_v19  ;;  %2178 = vperm.xlu1 %3018, %v3152_v33  }
 0x229   : > { %1766 = vmatpush1.bf16.msra.mxu0 %v1445_v22 }
 0x22a   : > { %v1457_v54 = vpop.permute.xlu1 %1456 }
 0x22c   : > { %1768 = vmatmul.mubr.bf16.vlgmr.msra.gmra.mrb[0].mxu0 %v3021_v41  ;;  %v1465_v41 = vpop.permute.xlu0 %1464 }
 0x22d   : > { %1777 = vmatprep.mubr.bf16.mxu0 %v3024_v11 }
 0x22e   : > { %v1461_v60 = vpop.permute.xlu1 %1460 }
 0x234   : > { %1778 = vmatmul.mubr.bf16.gmra.mrb[4].mxu0 %v3026_v45 }
 0x235   : > { %1787 = vmatprep.mubr.bf16.mxu0 %v3027_v37 }
 0x23c   : > { %1788 = vmatmul.mubr.bf16.gmra.mrb[8].mxu0 %v3029_v18  ;;  %v1469_v18 = vpop.permute.xlu1 %1468 }
 0x23d   : > { %1797 = vmatprep.mubr.bf16.mxu0 %v3030_v25 }
 0x244   : > { %1798 = vmatmul.mubr.bf16.gmra.mrb[12].mxu0 %v3032_v56 }
 0x245   : > { %1807 = vmatprep.mubr.bf16.mxu0 %v3033_v46 }
 0x24c   : > { %1808 = vmatmul.mubr.bf16.gmra.mrb[16].mxu0 %v3035_v49 }
 0x24d   : > { %1817 = vmatprep.mubr.bf16.mxu0 %v3036_v53 }
 0x254   : > { %1818 = vmatmul.mubr.bf16.gmra.mrb[20].mxu0 %v3038_v29 }
 0x255   : > { %1827 = vmatprep.mubr.bf16.mxu0 %v3039_v13 }
 0x25c   : > { %1828 = vmatmul.mubr.bf16.gmra.mrb[24].mxu0 %v3041_v7 }
 0x25d   : > { %1837 = vmatprep.mubr.bf16.mxu0 %v3042_v43 }
 0x264   : > { %1838 = vmatmul.mubr.bf16.gmra.mrb[28].mxu0 %v3044_v17 }
 0x265   : > { %1847 = vmatprep.mubr.bf16.mxu0 %v3045_v34  ;;  %v1473_v34 = vpop.permute.xlu0 %1472 }
 0x26c   : > { %1848 = vmatmul.mubr.bf16.gmra.mrb[32].mxu0 %v3047_v55 }
 0x26d   : > { %1857 = vmatprep.mubr.bf16.mxu0 %v3048_v38 }
 0x274   : > { %1858 = vmatmul.mubr.bf16.gmra.mrb[36].mxu0 %v3050_v32 }
 0x275   : > { %1867 = vmatprep.mubr.bf16.mxu0 %v3051_v21 }
 0x27c   : > { %1868 = vmatmul.mubr.bf16.gmra.mrb[40].mxu0 %v3053_v59  ;;  %v1477_v59 = vpop.permute.xlu1 %1476 }
 0x27d   : > { %1877 = vmatprep.mubr.bf16.mxu0 %v3054_v6 }
 0x284   : > { %1878 = vmatmul.mubr.bf16.gmra.mrb[44].mxu0 %v3056_v9 }
 0x285   : > { %1887 = vmatprep.mubr.bf16.mxu0 %v3057_v1 }
 0x28c   : > { %1888 = vmatmul.mubr.bf16.gmra.mrb[48].mxu0 %v3059_v47 }
 0x28d   : > { %1897 = vmatprep.mubr.bf16.mxu0 %v3060_v30 }
 0x294   : > { %1898 = vmatmul.mubr.bf16.gmra.mrb[52].mxu0 %v3062_v51 }
 0x295   : > { %1907 = vmatprep.mubr.bf16.mxu0 %v3063_v23 }
 0x29c   : > { %1908 = vmatmul.mubr.bf16.gmra.mrb[56].mxu0 %v3065_v15 }
 0x29d   : > { %1917 = vmatprep.mubr.bf16.mxu0 %v3066_v48 }
 0x2a4   : > { %1918 = vmatmul.mubr.bf16.gmra.mrb[60].mxu0 %v3068_v0 }
 0x2ff   : > { %v1769_v52 = vpop.f32.mrb[0].mxu0 }
 0x300   : > { %v1770_v36 = vadd.f32 %v1769_v52, %v1449_v16  ;;  %v1771_v61 = vpop.f32.mrb[1].mxu0 }
 0x301   : > { %v1772_v8 = vadd.f32 %v1771_v61, %v1449_v16  ;;  %v1773_v4 = vpop.f32.mrb[2].mxu0  ;;  %v1481_v16 = vpop.permute.xlu0 %1480 }
 0x302   : > { %v1774_v26 = vadd.f32 %v1773_v4, %v1453_v2  ;;  %v1775_v24 = vpop.f32.mrb[3].mxu0  ;;  %v1928_v28 = vmax.f32 %v1770_v36, 0.0 }
 0x303   : > { %v1776_v40 = vadd.f32 %v1775_v24, %v1453_v2  ;;  %v1929_v27 = vmax.f32 %v1772_v8, 0.0  ;;  %v1485_v8 = vpop.permute.xlu1 %1484 }
 0x304   : > { %v1930_v12 = vmax.f32 %v1774_v26, 0.0 }
 0x305   : > { %v1931_v20 = vmax.f32 %v1776_v40, 0.0 }
 0x306   : > { %v2025_v62 = vpack.c.bf16 %v1930_v12, %v1928_v28 }
 0x307   : > { %v1779_v3 = vpop.f32.mrb[4].mxu0  ;;  %v2026_v50 = vpack.c.bf16 %v1931_v20, %v1929_v27 }
 0x308   : > { %v1780_v57 = vadd.f32 %v1779_v3, %v1457_v54  ;;  %v1781_v42 = vpop.f32.mrb[5].mxu0 }
 0x309   : > { %v1782_v35 = vadd.f32 %v1781_v42, %v1457_v54  ;;  %v1783_v31 = vpop.f32.mrb[6].mxu0  ;;  %2345 = vmatprep.subr.bf16.mxu1 %v2026_v50 }
 0x30a   : > { %v1784_v39 = vadd.f32 %v1783_v31, %v1461_v60  ;;  %v1785_v14 = vpop.f32.mrb[7].mxu0  ;;  %2346 = vmatpush1.bf16.msra.mxu1 %v2025_v62  ;;  %v1932_v63 = vmax.f32 %v1780_v57, 0.0  ;;  %v1489_v62 = vpop.permute.xlu0 %1488 }
 0x30b   : > { %v1786_v58 = vadd.f32 %v1785_v14, %v1461_v60  ;;  %v1933_v44 = vmax.f32 %v1782_v35, 0.0  ;;  %v1493_v60 = vpop.permute.xlu1 %1492 }
 0x30c   : > { %v1934_v10 = vmax.f32 %v1784_v39, 0.0 }
 0x30d   : > { %v1935_v19 = vmax.f32 %v1786_v58, 0.0 }
 0x30e   : > { %v2027_v22 = vpack.c.bf16 %v1934_v10, %v1932_v63 }
 0x30f   : > { %v2028_v33 = vpack.c.bf16 %v1935_v19, %v1933_v44  ;;  %v1789_v11 = vpop.f32.mrb[8].mxu0 }
 0x310   : > { %v1790_v45 = vadd.f32 %v1789_v11, %v1465_v41  ;;  %v1791_v37 = vpop.f32.mrb[9].mxu0 }
 0x311   : > { %v1792_v25 = vadd.f32 %v1791_v37, %v1465_v41  ;;  %v1793_v56 = vpop.f32.mrb[10].mxu0  ;;  %2347 = vmatprep.subr.bf16.mxu1 %v2028_v33  ;;  %v1497_v41 = vpop.permute.xlu0 %1496 }
 0x312   : > { %v1794_v46 = vadd.f32 %v1793_v56, %v1469_v18  ;;  %v1795_v49 = vpop.f32.mrb[11].mxu0  ;;  %2348 = vmatpush1.bf16.msra.mxu1 %v2027_v22  ;;  %v1936_v29 = vmax.f32 %v1790_v45, 0.0 }
 0x313   : > { %v1796_v53 = vadd.f32 %v1795_v49, %v1469_v18  ;;  %v1937_v7 = vmax.f32 %v1792_v25, 0.0  ;;  %v1501_v18 = vpop.permute.xlu1 %1500 }
 0x314   : > { %v1938_v13 = vmax.f32 %v1794_v46, 0.0 }
 0x315   : > { %v1939_v43 = vmax.f32 %v1796_v53, 0.0 }
 0x316   : > { %v2029_v17 = vpack.c.bf16 %v1938_v13, %v1936_v29 }
 0x317   : > { %v2030_v55 = vpack.c.bf16 %v1939_v43, %v1937_v7  ;;  %v1799_v38 = vpop.f32.mrb[12].mxu0 }
 0x318   : > { %v1800_v32 = vadd.f32 %v1799_v38, %v1473_v34  ;;  %v1801_v21 = vpop.f32.mrb[13].mxu0 }
 0x319   : > { %v1802_v6 = vadd.f32 %v1801_v21, %v1473_v34  ;;  %v1803_v9 = vpop.f32.mrb[14].mxu0  ;;  %2349 = vmatprep.subr.bf16.mxu1 %v2030_v55  ;;  %v1505_v34 = vpop.permute.xlu0 %1504 }
 0x31a   : > { %v1804_v1 = vadd.f32 %v1803_v9, %v1477_v59  ;;  %v1805_v47 = vpop.f32.mrb[15].mxu0  ;;  %2350 = vmatpush1.bf16.msra.mxu1 %v2029_v17  ;;  %v1940_v51 = vmax.f32 %v1800_v32, 0.0 }
 0x31b   : > { %v1806_v30 = vadd.f32 %v1805_v47, %v1477_v59  ;;  %v1941_v15 = vmax.f32 %v1802_v6, 0.0  ;;  %v1509_v59 = vpop.permute.xlu1 %1508 }
 0x31c   : > { %v1942_v23 = vmax.f32 %v1804_v1, 0.0 }
 0x31d   : > { %v1943_v48 = vmax.f32 %v1806_v30, 0.0 }
 0x31e   : > { %v2031_v0 = vpack.c.bf16 %v1942_v23, %v1940_v51 }
 0x31f   : > { %v2032_v52 = vpack.c.bf16 %v1943_v48, %v1941_v15  ;;  %v1809_v2 = vpop.f32.mrb[16].mxu0 }
 0x320   : > { %v1810_v36 = vadd.f32 %v1809_v2, %v1481_v16  ;;  %v1811_v61 = vpop.f32.mrb[17].mxu0 }
 0x321   : > { %v1812_v4 = vadd.f32 %v1811_v61, %v1481_v16  ;;  %v1813_v26 = vpop.f32.mrb[18].mxu0  ;;  %2351 = vmatprep.subr.bf16.mxu1 %v2032_v52  ;;  %v1513_v16 = vpop.permute.xlu0 %1512 }
 0x322   : > { %v1814_v24 = vadd.f32 %v1813_v26, %v1485_v8  ;;  %v1815_v5 = vpop.f32.mrb[19].mxu0  ;;  %2352 = vmatpush1.bf16.msra.mxu1 %v2031_v0  ;;  %v1944_v40 = vmax.f32 %v1810_v36, 0.0 }
 0x323   : > { %v1816_v54 = vadd.f32 %v1815_v5, %v1485_v8  ;;  %v1945_v12 = vmax.f32 %v1812_v4, 0.0  ;;  %v1517_v8 = vpop.permute.xlu1 %1516 }
 0x324   : > { %v1946_v28 = vmax.f32 %v1814_v24, 0.0 }
 0x325   : > { %v1947_v27 = vmax.f32 %v1816_v54, 0.0 }
 0x326   : > { %v2033_v20 = vpack.c.bf16 %v1946_v28, %v1944_v40 }
 0x327   : > { %v2034_v3 = vpack.c.bf16 %v1947_v27, %v1945_v12  ;;  %v1819_v50 = vpop.f32.mrb[20].mxu0 }
 0x328   : > { %v1820_v57 = vadd.f32 %v1819_v50, %v1489_v62  ;;  %v1821_v42 = vpop.f32.mrb[21].mxu0 }
 0x329   : > { %v1822_v35 = vadd.f32 %v1821_v42, %v1489_v62  ;;  %v1823_v31 = vpop.f32.mrb[22].mxu0  ;;  %2353 = vmatprep.subr.bf16.mxu1 %v2034_v3  ;;  %v1521_v62 = vpop.permute.xlu0 %1520 }
 0x32a   : > { %v1824_v39 = vadd.f32 %v1823_v31, %v1493_v60  ;;  %v1825_v14 = vpop.f32.mrb[23].mxu0  ;;  %2354 = vmatpush1.bf16.msra.mxu1 %v2033_v20  ;;  %v1948_v63 = vmax.f32 %v1820_v57, 0.0 }
 0x32b   : > { %v1826_v58 = vadd.f32 %v1825_v14, %v1493_v60  ;;  %v1949_v44 = vmax.f32 %v1822_v35, 0.0  ;;  %v1525_v60 = vpop.permute.xlu1 %1524 }
 0x32c   : > { %v1950_v10 = vmax.f32 %v1824_v39, 0.0 }
 0x32d   : > { %v1951_v19 = vmax.f32 %v1826_v58, 0.0 }
 0x32e   : > { %v2035_v22 = vpack.c.bf16 %v1950_v10, %v1948_v63 }
 0x32f   : > { %v2036_v33 = vpack.c.bf16 %v1951_v19, %v1949_v44  ;;  %v1829_v11 = vpop.f32.mrb[24].mxu0 }
 0x330   : > { %v1830_v45 = vadd.f32 %v1829_v11, %v1497_v41  ;;  %v1831_v37 = vpop.f32.mrb[25].mxu0 }
 0x331   : > { %v1832_v25 = vadd.f32 %v1831_v37, %v1497_v41  ;;  %v1833_v56 = vpop.f32.mrb[26].mxu0  ;;  %2355 = vmatprep.subr.bf16.mxu1 %v2036_v33  ;;  %v1529_v41 = vpop.permute.xlu0 %1528 }
 0x332   : > { %v1834_v46 = vadd.f32 %v1833_v56, %v1501_v18  ;;  %v1835_v49 = vpop.f32.mrb[27].mxu0  ;;  %2356 = vmatpush1.bf16.msra.mxu1 %v2035_v22  ;;  %v1952_v29 = vmax.f32 %v1830_v45, 0.0 }
 0x333   : > { %v1836_v53 = vadd.f32 %v1835_v49, %v1501_v18  ;;  %v1953_v7 = vmax.f32 %v1832_v25, 0.0  ;;  %v1533_v18 = vpop.permute.xlu1 %1532 }
 0x334   : > { %v1954_v13 = vmax.f32 %v1834_v46, 0.0 }
 0x335   : > { %v1955_v43 = vmax.f32 %v1836_v53, 0.0 }
 0x336   : > { %v2037_v17 = vpack.c.bf16 %v1954_v13, %v1952_v29 }
 0x337   : > { %v2038_v55 = vpack.c.bf16 %v1955_v43, %v1953_v7  ;;  %v1839_v38 = vpop.f32.mrb[28].mxu0 }
 0x338   : > { %v1840_v32 = vadd.f32 %v1839_v38, %v1505_v34  ;;  %v1841_v21 = vpop.f32.mrb[29].mxu0 }
 0x339   : > { %v1842_v6 = vadd.f32 %v1841_v21, %v1505_v34  ;;  %v1843_v9 = vpop.f32.mrb[30].mxu0  ;;  %2357 = vmatprep.subr.bf16.mxu1 %v2038_v55  ;;  %v1537_v34 = vpop.permute.xlu0 %1536 }
 0x33a   : > { %v1844_v1 = vadd.f32 %v1843_v9, %v1509_v59  ;;  %v1845_v47 = vpop.f32.mrb[31].mxu0  ;;  %2358 = vmatpush1.bf16.msra.mxu1 %v2037_v17  ;;  %v1956_v51 = vmax.f32 %v1840_v32, 0.0 }
 0x33b   : > { %v1846_v30 = vadd.f32 %v1845_v47, %v1509_v59  ;;  %v1957_v15 = vmax.f32 %v1842_v6, 0.0  ;;  %v1541_v59 = vpop.permute.xlu1 %1540 }
 0x33c   : > { %v1958_v23 = vmax.f32 %v1844_v1, 0.0 }
 0x33d   : > { %v1959_v48 = vmax.f32 %v1846_v30, 0.0 }
 0x33e   : > { %v2039_v0 = vpack.c.bf16 %v1958_v23, %v1956_v51 }
 0x33f   : > { %v2040_v52 = vpack.c.bf16 %v1959_v48, %v1957_v15  ;;  %v1849_v2 = vpop.f32.mrb[32].mxu0 }
 0x340   : > { %v1850_v36 = vadd.f32 %v1849_v2, %v1513_v16  ;;  %v1851_v61 = vpop.f32.mrb[33].mxu0 }
 0x341   : > { %v1852_v4 = vadd.f32 %v1851_v61, %v1513_v16  ;;  %v1853_v26 = vpop.f32.mrb[34].mxu0  ;;  %2359 = vmatprep.subr.bf16.mxu1 %v2040_v52  ;;  %v1545_v16 = vpop.permute.xlu0 %1544 }
 0x342   : > { %v1854_v24 = vadd.f32 %v1853_v26, %v1517_v8  ;;  %v1855_v5 = vpop.f32.mrb[35].mxu0  ;;  %2360 = vmatpush1.bf16.msra.mxu1 %v2039_v0  ;;  %v1960_v40 = vmax.f32 %v1850_v36, 0.0 }
 0x343   : > { %v1856_v54 = vadd.f32 %v1855_v5, %v1517_v8  ;;  %v1961_v12 = vmax.f32 %v1852_v4, 0.0  ;;  %v1549_v8 = vpop.permute.xlu1 %1548 }
 0x344   : > { %v1962_v28 = vmax.f32 %v1854_v24, 0.0 }
 0x345   : > { %v1963_v27 = vmax.f32 %v1856_v54, 0.0 }
 0x346   : > { %v2041_v20 = vpack.c.bf16 %v1962_v28, %v1960_v40 }
 0x347   : > { %v2042_v3 = vpack.c.bf16 %v1963_v27, %v1961_v12  ;;  %v1859_v50 = vpop.f32.mrb[36].mxu0 }
 0x348   : > { %v1860_v57 = vadd.f32 %v1859_v50, %v1521_v62  ;;  %v1861_v42 = vpop.f32.mrb[37].mxu0 }
 0x349   : > { %v1862_v35 = vadd.f32 %v1861_v42, %v1521_v62  ;;  %v1863_v31 = vpop.f32.mrb[38].mxu0  ;;  %2361 = vmatprep.subr.bf16.mxu1 %v2042_v3  ;;  %v1553_v62 = vpop.permute.xlu0 %1552 }
 0x34a   : > { %v1864_v39 = vadd.f32 %v1863_v31, %v1525_v60  ;;  %v1865_v14 = vpop.f32.mrb[39].mxu0  ;;  %2362 = vmatpush1.bf16.msra.mxu1 %v2041_v20  ;;  %v1964_v63 = vmax.f32 %v1860_v57, 0.0 }
 0x34b   : > { %v1866_v58 = vadd.f32 %v1865_v14, %v1525_v60  ;;  %v1965_v44 = vmax.f32 %v1862_v35, 0.0  ;;  %v1557_v60 = vpop.permute.xlu1 %1556 }
 0x34c   : > { %v1966_v10 = vmax.f32 %v1864_v39, 0.0 }
 0x34d   : > { %v1967_v19 = vmax.f32 %v1866_v58, 0.0 }
 0x34e   : > { %v2043_v22 = vpack.c.bf16 %v1966_v10, %v1964_v63 }
 0x34f   : > { %v2044_v33 = vpack.c.bf16 %v1967_v19, %v1965_v44  ;;  %v1869_v11 = vpop.f32.mrb[40].mxu0 }
 0x350   : > { %v1870_v45 = vadd.f32 %v1869_v11, %v1529_v41  ;;  %v1871_v37 = vpop.f32.mrb[41].mxu0 }
 0x351   : > { %v1872_v25 = vadd.f32 %v1871_v37, %v1529_v41  ;;  %v1873_v56 = vpop.f32.mrb[42].mxu0  ;;  %2363 = vmatprep.subr.bf16.mxu1 %v2044_v33  ;;  %v1561_v41 = vpop.permute.xlu0 %1560 }
 0x352   : > { %v1874_v46 = vadd.f32 %v1873_v56, %v1533_v18  ;;  %v1875_v49 = vpop.f32.mrb[43].mxu0  ;;  %2364 = vmatpush1.bf16.msra.mxu1 %v2043_v22  ;;  %v1968_v29 = vmax.f32 %v1870_v45, 0.0 }
 0x353   : > { %v1876_v53 = vadd.f32 %v1875_v49, %v1533_v18  ;;  %v1969_v7 = vmax.f32 %v1872_v25, 0.0  ;;  %v1565_v18 = vpop.permute.xlu1 %1564 }
 0x354   : > { %v1970_v13 = vmax.f32 %v1874_v46, 0.0 }
 0x355   : > { %v1971_v43 = vmax.f32 %v1876_v53, 0.0 }
 0x356   : > { %v2045_v17 = vpack.c.bf16 %v1970_v13, %v1968_v29 }
 0x357   : > { %v2046_v55 = vpack.c.bf16 %v1971_v43, %v1969_v7  ;;  %v1879_v38 = vpop.f32.mrb[44].mxu0 }
 0x358   : > { %v1880_v32 = vadd.f32 %v1879_v38, %v1537_v34  ;;  %v1881_v21 = vpop.f32.mrb[45].mxu0 }
 0x359   : > { %v1882_v6 = vadd.f32 %v1881_v21, %v1537_v34  ;;  %v1883_v9 = vpop.f32.mrb[46].mxu0  ;;  %2365 = vmatprep.subr.bf16.mxu1 %v2046_v55  ;;  %v1569_v34 = vpop.permute.xlu0 %1568 }
 0x35a   : > { %v1884_v1 = vadd.f32 %v1883_v9, %v1541_v59  ;;  %v1885_v47 = vpop.f32.mrb[47].mxu0  ;;  %2366 = vmatpush1.bf16.msra.mxu1 %v2045_v17  ;;  %v1972_v51 = vmax.f32 %v1880_v32, 0.0 }
 0x35b   : > { %v1886_v30 = vadd.f32 %v1885_v47, %v1541_v59  ;;  %v1973_v15 = vmax.f32 %v1882_v6, 0.0  ;;  %v1573_v59 = vpop.permute.xlu1 %1572 }
 0x35c   : > { %v1974_v23 = vmax.f32 %v1884_v1, 0.0 }
 0x35d   : > { %v1975_v48 = vmax.f32 %v1886_v30, 0.0 }
 0x35e   : > { %v2047_v0 = vpack.c.bf16 %v1974_v23, %v1972_v51 }
 0x35f   : > { %v2048_v52 = vpack.c.bf16 %v1975_v48, %v1973_v15  ;;  %v1889_v2 = vpop.f32.mrb[48].mxu0 }
 0x360   : > { %v1890_v36 = vadd.f32 %v1889_v2, %v1545_v16  ;;  %v1891_v61 = vpop.f32.mrb[49].mxu0  ;;  %v3072_v2 = vld [vmem:[%s4552_s2 + $0x114] ss:$8 sps:$4 sm:$0xff]  }
 0x361   : > { %v1892_v4 = vadd.f32 %v1891_v61, %v1545_v16  ;;  %v1893_v26 = vpop.f32.mrb[50].mxu0  ;;  %2367 = vmatprep.subr.bf16.mxu1 %v2048_v52  ;;  %v3069_v52 = vld [vmem:[%s4552_s2 + $0x100] ss:$8 sps:$4 sm:$0xff]   ;;  %v3075_v61 = vld [vmem:[%s4552_s2 + $0x124] ss:$8 sps:$4 sm:$0xff]  }
 0x362   : > { %v1894_v24 = vadd.f32 %v1893_v26, %v1549_v8  ;;  %v1895_v5 = vpop.f32.mrb[51].mxu0  ;;  %2368 = vmatpush1.bf16.msra.mxu1 %v2047_v0  ;;  %v1976_v40 = vmax.f32 %v1890_v36, 0.0  ;;  %v3074_v36 = vld [vmem:[%s4552_s2 + $0x110] ss:$8 sps:$4 sm:$0xff]  }
 0x363   : > { %v1896_v54 = vadd.f32 %v1895_v5, %v1549_v8  ;;  %v1977_v12 = vmax.f32 %v1892_v4, 0.0  ;;  %v3077_v8 = vld [vmem:[%s4552_s2 + $0x120] ss:$8 sps:$4 sm:$0xff]   ;;  %v3078_v4 = vld [vmem:[%s4552_s2 + $0x134] ss:$8 sps:$4 sm:$0xff]  }
 0x364   : > { %v1978_v28 = vmax.f32 %v1894_v24, 0.0  ;;  %v3080_v26 = vld [vmem:[%s4552_s2 + $0x130] ss:$8 sps:$4 sm:$0xff]   ;;  %v3081_v24 = vld [vmem:[%s4552_s2 + $0x144] ss:$8 sps:$4 sm:$0xff]  }
 0x365   : > { %v1979_v27 = vmax.f32 %v1896_v54, 0.0  ;;  %v3083_v5 = vld [vmem:[%s4552_s2 + $0x140] ss:$8 sps:$4 sm:$0xff]   ;;  %v3084_v54 = vld [vmem:[%s4552_s2 + $0x154] ss:$8 sps:$4 sm:$0xff]  }
 0x366   : > { %v2049_v20 = vpack.c.bf16 %v1978_v28, %v1976_v40  ;;  %v3086_v40 = vld [vmem:[%s4552_s2 + $0x150] ss:$8 sps:$4 sm:$0xff]   ;;  %v3087_v28 = vld [vmem:[%s4552_s2 + $0x164] ss:$8 sps:$4 sm:$0xff]  }
 0x367   : > { %v2050_v3 = vpack.c.bf16 %v1979_v27, %v1977_v12  ;;  %v1899_v50 = vpop.f32.mrb[52].mxu0  ;;  %v3089_v12 = vld [vmem:[%s4552_s2 + $0x160] ss:$8 sps:$4 sm:$0xff]   ;;  %v3090_v27 = vld [vmem:[%s4552_s2 + $0x174] ss:$8 sps:$4 sm:$0xff]  }
 0x368   : > { %v1900_v57 = vadd.f32 %v1899_v50, %v1553_v62  ;;  %v1901_v42 = vpop.f32.mrb[53].mxu0  ;;  %v3096_v50 = vld [vmem:[%s4552_s2 + $0x194] ss:$8 sps:$4 sm:$0xff]  }
 0x369   : > { %v1902_v35 = vadd.f32 %v1901_v42, %v1553_v62  ;;  %v1903_v31 = vpop.f32.mrb[54].mxu0  ;;  %2369 = vmatprep.subr.bf16.mxu1 %v2050_v3  ;;  %v3093_v62 = vld [vmem:[%s4552_s2 + $0x184] ss:$8 sps:$4 sm:$0xff]   ;;  %v3095_v3 = vld [vmem:[%s4552_s2 + $0x180] ss:$8 sps:$4 sm:$0xff]  }
 0x36a   : > { %v1904_v39 = vadd.f32 %v1903_v31, %v1557_v60  ;;  %v1905_v14 = vpop.f32.mrb[55].mxu0  ;;  %2370 = vmatpush1.bf16.msra.mxu1 %v2049_v20  ;;  %v1980_v63 = vmax.f32 %v1900_v57, 0.0  ;;  %v3092_v20 = vld [vmem:[%s4552_s2 + $0x170] ss:$8 sps:$4 sm:$0xff]   ;;  %v3099_v42 = vld [vmem:[%s4552_s2 + $0x1a4] ss:$8 sps:$4 sm:$0xff]  }
 0x36b   : > { %v1906_v58 = vadd.f32 %v1905_v14, %v1557_v60  ;;  %v1981_v44 = vmax.f32 %v1902_v35, 0.0  ;;  %v3098_v57 = vld [vmem:[%s4552_s2 + $0x190] ss:$8 sps:$4 sm:$0xff]   ;;  %v3101_v60 = vld [vmem:[%s4552_s2 + $0x1a0] ss:$8 sps:$4 sm:$0xff]  }
 0x36c   : > { %v1982_v10 = vmax.f32 %v1904_v39, 0.0  ;;  %v3102_v35 = vld [vmem:[%s4552_s2 + $0x1b4] ss:$8 sps:$4 sm:$0xff]   ;;  %v3104_v31 = vld [vmem:[%s4552_s2 + $0x1b0] ss:$8 sps:$4 sm:$0xff]  }
 0x36d   : > { %v1983_v19 = vmax.f32 %v1906_v58, 0.0  ;;  %v3105_v39 = vld [vmem:[%s4552_s2 + $0x1c4] ss:$8 sps:$4 sm:$0xff]   ;;  %v3107_v14 = vld [vmem:[%s4552_s2 + $0x1c0] ss:$8 sps:$4 sm:$0xff]  }
 0x36e   : > { %v2051_v22 = vpack.c.bf16 %v1982_v10, %v1980_v63  ;;  %v3108_v58 = vld [vmem:[%s4552_s2 + $0x1d4] ss:$8 sps:$4 sm:$0xff]   ;;  %v3110_v63 = vld [vmem:[%s4552_s2 + $0x1d0] ss:$8 sps:$4 sm:$0xff]   ;;  %v3111_v10 = vld [vmem:[%s4552_s2 + $0x1e4] ss:$8 sps:$4 sm:$0xff]  }
 0x36f   : > { %v2052_v33 = vpack.c.bf16 %v1983_v19, %v1981_v44  ;;  %v1909_v11 = vpop.f32.mrb[56].mxu0  ;;  %v3113_v44 = vld [vmem:[%s4552_s2 + $0x1e0] ss:$8 sps:$4 sm:$0xff]   ;;  %v3114_v19 = vld [vmem:[%s4552_s2 + $0x1f4] ss:$8 sps:$4 sm:$0xff]  }
 0x370   : > { %v1910_v45 = vadd.f32 %v1909_v11, %v1561_v41  ;;  %v1911_v37 = vpop.f32.mrb[57].mxu0 }
 0x371   : > { %v1912_v25 = vadd.f32 %v1911_v37, %v1561_v41  ;;  %v1913_v56 = vpop.f32.mrb[58].mxu0  ;;  %2371 = vmatprep.subr.bf16.mxu1 %v2052_v33  ;;  %v2059_v41 = vpop.permute.xlu0 %2058 }
 0x372   : > { %v1914_v46 = vadd.f32 %v1913_v56, %v1565_v18  ;;  %v1915_v49 = vpop.f32.mrb[59].mxu0  ;;  %2372 = vmatpush1.bf16.msra.mxu1 %v2051_v22  ;;  %v1984_v29 = vmax.f32 %v1910_v45, 0.0  ;;  %v3116_v22 = vld [vmem:[%s4552_s2 + $0x1f0] ss:$8 sps:$4 sm:$0xff]   ;;  %v2063_v33 = vpop.permute.xlu1 %2062 }
 0x373   : > { %v1916_v53 = vadd.f32 %v1915_v49, %v1565_v18  ;;  %v1985_v7 = vmax.f32 %v1912_v25, 0.0  ;;  %v4495_v49 = vld.sshfl [vmem:[#allocation2] sm:$0x33 pattern:$0x76325410] }
 0x374   : > { %v1986_v13 = vmax.f32 %v1914_v46, 0.0 }
 0x375   : > { %v1987_v43 = vmax.f32 %v1916_v53, 0.0 }
 0x376   : > { %v2053_v17 = vpack.c.bf16 %v1986_v13, %v1984_v29  ;;  %v2649_v29 = vcombine.high %v4495_v49, %v4495_v49 }
 0x377   : > { %v2054_v55 = vpack.c.bf16 %v1987_v43, %v1985_v7  ;;  %v1919_v38 = vpop.f32.mrb[60].mxu0  ;;  %v2067_v43 = vpop.permute.xlu1 %2066 }
 0x378   : > { %v1920_v32 = vadd.f32 %v1919_v38, %v1569_v34  ;;  %v1921_v21 = vpop.f32.mrb[61].mxu0  ;;  %2684 = vmatprep.mubr.bf16.mxu0 %v2649_v29 }
 0x379   : > { %v1922_v6 = vadd.f32 %v1921_v21, %v1569_v34  ;;  %v1923_v9 = vpop.f32.mrb[62].mxu0  ;;  %2373 = vmatprep.subr.bf16.mxu1 %v2054_v55  ;;  %v2635_v55 = vld [vmem:[%s4554_s4] sm:$0x7] }
 0x37a   : > { %v1924_v1 = vadd.f32 %v1923_v9, %v1573_v59  ;;  %v1925_v47 = vpop.f32.mrb[63].mxu0  ;;  %2374 = vmatpush1.bf16.msra.mxu1 %v2053_v17  ;;  %v1988_v51 = vmax.f32 %v1920_v32, 0.0  ;;  %v3253_v32 = vmov 3  }
 0x37b   : > { %v1926_v30 = vadd.f32 %v1925_v47, %v1573_v59  ;;  %v1989_v15 = vmax.f32 %v1922_v6, 0.0  ;;  %3019 = vset.pattern.permute.xlu1 %v3253_v32  ;;  %3020 = vset.pattern.permute.xlu0 %v3253_v32 }
 0x37c   : > { %v1990_v23 = vmax.f32 %v1924_v1, 0.0  ;;  %2638 = vperm.xlu1 %3019, %v2635_v55   ;;  %v2071_v1 = vpop.permute.xlu0 %2070 }
 0x37d   : > { %v1991_v48 = vmax.f32 %v1926_v30, 0.0 }
 0x37e   : > { %v2055_v0 = vpack.c.bf16 %v1990_v23, %v1988_v51 }
 0x37f   : > { %v2056_v16 = vpack.c.bf16 %v1991_v48, %v1989_v15 }
 0x381   : > { %2375 = vmatprep.subr.bf16.mxu1 %v2056_v16 }
 0x382   : > { %2376 = vmatpush1.bf16.msra.mxu1 %v2055_v0 }
 0x385   : > { %2378 = vmatmul.mubr.bf16.vlgmr.msra.gmra.mrb[0].mxu1 %v3069_v52 }
 0x386   : > { %2387 = vmatprep.mubr.bf16.mxu1 %v3072_v2 }
 0x38d   : > { %2388 = vmatmul.mubr.bf16.gmra.mrb[4].mxu1 %v3074_v36  ;;  %v2075_v36 = vpop.permute.xlu1 %2074 }
 0x38e   : > { %2397 = vmatprep.mubr.bf16.mxu1 %v3075_v61 }
 0x395   : > { %2398 = vmatmul.mubr.bf16.gmra.mrb[8].mxu1 %v3077_v8 }
 0x396   : > { %2407 = vmatprep.mubr.bf16.mxu1 %v3078_v4 }
 0x39d   : > { %2408 = vmatmul.mubr.bf16.gmra.mrb[12].mxu1 %v3080_v26 }
 0x39e   : > { %2417 = vmatprep.mubr.bf16.mxu1 %v3081_v24  ;;  %v2079_v24 = vpop.permute.xlu0 %2078 }
 0x3a5   : > { %2418 = vmatmul.mubr.bf16.gmra.mrb[16].mxu1 %v3083_v5 }
 0x3a6   : > { %2427 = vmatprep.mubr.bf16.mxu1 %v3084_v54 }
 0x3ad   : > { %2428 = vmatmul.mubr.bf16.gmra.mrb[20].mxu1 %v3086_v40 }
 0x3ae   : > { %2437 = vmatprep.mubr.bf16.mxu1 %v3087_v28 }
 0x3b5   : > { %2438 = vmatmul.mubr.bf16.gmra.mrb[24].mxu1 %v3089_v12 }
 0x3b6   : > { %2447 = vmatprep.mubr.bf16.mxu1 %v3090_v27 }
 0x3bd   : > { %2448 = vmatmul.mubr.bf16.gmra.mrb[28].mxu1 %v3092_v20 }
 0x3be   : > { %2457 = vmatprep.mubr.bf16.mxu1 %v3093_v62 }
 0x3c5   : > { %2458 = vmatmul.mubr.bf16.gmra.mrb[32].mxu1 %v3095_v3 }
 0x3c6   : > { %2467 = vmatprep.mubr.bf16.mxu1 %v3096_v50 }
 0x3cd   : > { %2468 = vmatmul.mubr.bf16.gmra.mrb[36].mxu1 %v3098_v57  ;;  %v2083_v57 = vpop.permute.xlu1 %2082 }
 0x3ce   : > { %2477 = vmatprep.mubr.bf16.mxu1 %v3099_v42 }
 0x3d5   : > { %2478 = vmatmul.mubr.bf16.gmra.mrb[40].mxu1 %v3101_v60 }
 0x3d6   : > { %2487 = vmatprep.mubr.bf16.mxu1 %v3102_v35 }
 0x3dd   : > { %2488 = vmatmul.mubr.bf16.gmra.mrb[44].mxu1 %v3104_v31 }
 0x3de   : > { %2497 = vmatprep.mubr.bf16.mxu1 %v3105_v39  ;;  %v2087_v39 = vpop.permute.xlu0 %2086 }
 0x3e5   : > { %2498 = vmatmul.mubr.bf16.gmra.mrb[48].mxu1 %v3107_v14 }
 0x3e6   : > { %2507 = vmatprep.mubr.bf16.mxu1 %v3108_v58 }
 0x3ed   : > { %2508 = vmatmul.mubr.bf16.gmra.mrb[52].mxu1 %v3110_v63 }
 0x3ee   : > { %2517 = vmatprep.mubr.bf16.mxu1 %v3111_v10 }
 0x3f5   : > { %2518 = vmatmul.mubr.bf16.gmra.mrb[56].mxu1 %v3113_v44 }
 0x3f6   : > { %2527 = vmatprep.mubr.bf16.mxu1 %v3114_v19 }
 0x3fd   : > { %2528 = vmatmul.mubr.bf16.gmra.mrb[60].mxu1 %v3116_v22 }
 0x458   : > { %v2379_v11 = vpop.f32.mrb[0].mxu1 }
 0x459   : > { %v2380_v45 = vadd.f32 %v2379_v11, %v2059_v41  ;;  %v2381_v37 = vpop.f32.mrb[1].mxu1 }
 0x45a   : > { %v2382_v18 = vadd.f32 %v2381_v37, %v2059_v41  ;;  %v2383_v25 = vpop.f32.mrb[2].mxu1 }
 0x45b   : > { %v2384_v56 = vadd.f32 %v2383_v25, %v2063_v33  ;;  %v2385_v46 = vpop.f32.mrb[3].mxu1  ;;  %v2538_v13 = vmax.f32 %v2380_v45, 0.0  ;;  %v2091_v45 = vpop.permute.xlu1 %2090 }
 0x45c   : > { %v2386_v53 = vadd.f32 %v2385_v46, %v2063_v33  ;;  %v2539_v17 = vmax.f32 %v2382_v18, 0.0  ;;  %v2095_v46 = vpop.permute.xlu0 %2094 }
 0x45d   : > { %v2540_v7 = vmax.f32 %v2384_v56, 0.0 }
 0x45e   : > { %v2541_v34 = vmax.f32 %v2386_v53, 0.0 }
 0x45f   : > { %v2603_v38 = vpack.c.bf16 %v2540_v7, %v2538_v13 }
 0x460   : > { %v2604_v21 = vpack.c.bf16 %v2541_v34, %v2539_v17  ;;  %v2389_v59 = vpop.f32.mrb[4].mxu1 }
 0x461   : > { %v2390_v6 = vadd.f32 %v2389_v59, %v2067_v43  ;;  %v2391_v9 = vpop.f32.mrb[5].mxu1 }
 0x462   : > { %v2392_v47 = vadd.f32 %v2391_v9, %v2067_v43  ;;  %v2393_v30 = vpop.f32.mrb[6].mxu1  ;;  %2652 = vmatprep.subr.bf16.mxu0 %v2604_v21  ;;  %v2099_v21 = vpop.permute.xlu1 %2098 }
 0x463   : > { %v2394_v51 = vadd.f32 %v2393_v30, %v2071_v1  ;;  %v2395_v23 = vpop.f32.mrb[7].mxu1  ;;  %2653 = vmatpush1.bf16.msra.mxu0 %v2603_v38  ;;  %v2542_v48 = vmax.f32 %v2390_v6, 0.0 }
 0x464   : > { %v2396_v15 = vadd.f32 %v2395_v23, %v2071_v1  ;;  %v2543_v16 = vmax.f32 %v2392_v47, 0.0  ;;  %v2103_v47 = vpop.permute.xlu0 %2102 }
 0x465   : > { %v2544_v0 = vmax.f32 %v2394_v51, 0.0 }
 0x466   : > { %v2545_v52 = vmax.f32 %v2396_v15, 0.0 }
 0x467   : > { %v2605_v2 = vpack.c.bf16 %v2544_v0, %v2542_v48 }
 0x468   : > { %v2606_v61 = vpack.c.bf16 %v2545_v52, %v2543_v16  ;;  %v2399_v8 = vpop.f32.mrb[8].mxu1 }
 0x469   : > { %v2400_v4 = vadd.f32 %v2399_v8, %v2075_v36  ;;  %v2401_v26 = vpop.f32.mrb[9].mxu1 }
 0x46a   : > { %v2402_v5 = vadd.f32 %v2401_v26, %v2075_v36  ;;  %v2403_v54 = vpop.f32.mrb[10].mxu1  ;;  %2654 = vmatprep.subr.bf16.mxu0 %v2606_v61  ;;  %v2107_v61 = vpop.permute.xlu1 %2106 }
 0x46b   : > { %v2404_v40 = vadd.f32 %v2403_v54, %v2079_v24  ;;  %v2405_v28 = vpop.f32.mrb[11].mxu1  ;;  %2655 = vmatpush1.bf16.msra.mxu0 %v2605_v2  ;;  %v2546_v27 = vmax.f32 %v2400_v4, 0.0 }
 0x46c   : > { %v2406_v12 = vadd.f32 %v2405_v28, %v2079_v24  ;;  %v2547_v62 = vmax.f32 %v2402_v5, 0.0  ;;  %v2111_v5 = vpop.permute.xlu0 %2110 }
 0x46d   : > { %v2548_v20 = vmax.f32 %v2404_v40, 0.0 }
 0x46e   : > { %v2549_v3 = vmax.f32 %v2406_v12, 0.0 }
 0x46f   : > { %v2607_v50 = vpack.c.bf16 %v2548_v20, %v2546_v27 }
 0x470   : > { %v2608_v42 = vpack.c.bf16 %v2549_v3, %v2547_v62  ;;  %v2409_v60 = vpop.f32.mrb[12].mxu1 }
 0x471   : > { %v2410_v35 = vadd.f32 %v2409_v60, %v2083_v57  ;;  %v2411_v31 = vpop.f32.mrb[13].mxu1 }
 0x472   : > { %v2412_v14 = vadd.f32 %v2411_v31, %v2083_v57  ;;  %v2413_v58 = vpop.f32.mrb[14].mxu1  ;;  %2656 = vmatprep.subr.bf16.mxu0 %v2608_v42  ;;  %v2115_v42 = vpop.permute.xlu1 %2114 }
 0x473   : > { %v2414_v63 = vadd.f32 %v2413_v58, %v2087_v39  ;;  %v2415_v10 = vpop.f32.mrb[15].mxu1  ;;  %2657 = vmatpush1.bf16.msra.mxu0 %v2607_v50  ;;  %v2550_v19 = vmax.f32 %v2410_v35, 0.0 }
 0x474   : > { %v2416_v44 = vadd.f32 %v2415_v10, %v2087_v39  ;;  %v2551_v41 = vmax.f32 %v2412_v14, 0.0  ;;  %v2119_v14 = vpop.permute.xlu0 %2118 }
 0x475   : > { %v2552_v22 = vmax.f32 %v2414_v63, 0.0 }
 0x476   : > { %v2553_v33 = vmax.f32 %v2416_v44, 0.0 }
 0x477   : > { %v2609_v11 = vpack.c.bf16 %v2552_v22, %v2550_v19 }
 0x478   : > { %v2610_v37 = vpack.c.bf16 %v2553_v33, %v2551_v41  ;;  %v2419_v18 = vpop.f32.mrb[16].mxu1 }
 0x479   : > { %v2420_v25 = vadd.f32 %v2419_v18, %v2091_v45  ;;  %v2421_v56 = vpop.f32.mrb[17].mxu1 }
 0x47a   : > { %v2422_v53 = vadd.f32 %v2421_v56, %v2091_v45  ;;  %v2423_v29 = vpop.f32.mrb[18].mxu1  ;;  %2658 = vmatprep.subr.bf16.mxu0 %v2610_v37  ;;  %v2123_v37 = vpop.permute.xlu1 %2122 }
 0x47b   : > { %v2424_v13 = vadd.f32 %v2423_v29, %v2095_v46  ;;  %v2425_v7 = vpop.f32.mrb[19].mxu1  ;;  %2659 = vmatpush1.bf16.msra.mxu0 %v2609_v11  ;;  %v2554_v17 = vmax.f32 %v2420_v25, 0.0 }
 0x47c   : > { %v2426_v43 = vadd.f32 %v2425_v7, %v2095_v46  ;;  %v2555_v55 = vmax.f32 %v2422_v53, 0.0  ;;  %v2127_v53 = vpop.permute.xlu0 %2126 }
 0x47d   : > { %v2556_v34 = vmax.f32 %v2424_v13, 0.0 }
 0x47e   : > { %v2557_v38 = vmax.f32 %v2426_v43, 0.0 }
 0x47f   : > { %v2611_v32 = vpack.c.bf16 %v2556_v34, %v2554_v17 }
 0x480   : > { %v2612_v59 = vpack.c.bf16 %v2557_v38, %v2555_v55  ;;  %v2429_v6 = vpop.f32.mrb[20].mxu1 }
 0x481   : > { %v2430_v9 = vadd.f32 %v2429_v6, %v2099_v21  ;;  %v2431_v1 = vpop.f32.mrb[21].mxu1 }
 0x482   : > { %v2432_v30 = vadd.f32 %v2431_v1, %v2099_v21  ;;  %v2433_v51 = vpop.f32.mrb[22].mxu1  ;;  %2660 = vmatprep.subr.bf16.mxu0 %v2612_v59  ;;  %v2131_v59 = vpop.permute.xlu1 %2130 }
 0x483   : > { %v2434_v23 = vadd.f32 %v2433_v51, %v2103_v47  ;;  %v2435_v15 = vpop.f32.mrb[23].mxu1  ;;  %2661 = vmatpush1.bf16.msra.mxu0 %v2611_v32  ;;  %v2558_v0 = vmax.f32 %v2430_v9, 0.0 }
 0x484   : > { %v2436_v48 = vadd.f32 %v2435_v15, %v2103_v47  ;;  %v2559_v52 = vmax.f32 %v2432_v30, 0.0  ;;  %v2135_v30 = vpop.permute.xlu0 %2134 }
 0x485   : > { %v2560_v16 = vmax.f32 %v2434_v23, 0.0 }
 0x486   : > { %v2561_v2 = vmax.f32 %v2436_v48, 0.0 }
 0x487   : > { %v2613_v36 = vpack.c.bf16 %v2560_v16, %v2558_v0 }
 0x488   : > { %v2614_v8 = vpack.c.bf16 %v2561_v2, %v2559_v52  ;;  %v2439_v4 = vpop.f32.mrb[24].mxu1 }
 0x489   : > { %v2440_v26 = vadd.f32 %v2439_v4, %v2107_v61  ;;  %v2441_v24 = vpop.f32.mrb[25].mxu1 }
 0x48a   : > { %v2442_v54 = vadd.f32 %v2441_v24, %v2107_v61  ;;  %v2443_v40 = vpop.f32.mrb[26].mxu1  ;;  %2662 = vmatprep.subr.bf16.mxu0 %v2614_v8  ;;  %v2139_v8 = vpop.permute.xlu1 %2138 }
 0x48b   : > { %v2444_v28 = vadd.f32 %v2443_v40, %v2111_v5  ;;  %v2445_v12 = vpop.f32.mrb[27].mxu1  ;;  %2663 = vmatpush1.bf16.msra.mxu0 %v2613_v36  ;;  %v2562_v20 = vmax.f32 %v2440_v26, 0.0 }
 0x48c   : > { %v2446_v27 = vadd.f32 %v2445_v12, %v2111_v5  ;;  %v2563_v3 = vmax.f32 %v2442_v54, 0.0  ;;  %v2143_v54 = vpop.permute.xlu0 %2142 }
 0x48d   : > { %v2564_v62 = vmax.f32 %v2444_v28, 0.0 }
 0x48e   : > { %v2565_v50 = vmax.f32 %v2446_v27, 0.0 }
 0x48f   : > { %v2615_v57 = vpack.c.bf16 %v2564_v62, %v2562_v20 }
 0x490   : > { %v2616_v60 = vpack.c.bf16 %v2565_v50, %v2563_v3  ;;  %v2449_v35 = vpop.f32.mrb[28].mxu1 }
 0x491   : > { %v2450_v31 = vadd.f32 %v2449_v35, %v2115_v42  ;;  %v2451_v39 = vpop.f32.mrb[29].mxu1 }
 0x492   : > { %v2452_v58 = vadd.f32 %v2451_v39, %v2115_v42  ;;  %v2453_v63 = vpop.f32.mrb[30].mxu1  ;;  %2664 = vmatprep.subr.bf16.mxu0 %v2616_v60  ;;  %v2147_v60 = vpop.permute.xlu1 %2146 }
 0x493   : > { %v2454_v10 = vadd.f32 %v2453_v63, %v2119_v14  ;;  %v2455_v44 = vpop.f32.mrb[31].mxu1  ;;  %2665 = vmatpush1.bf16.msra.mxu0 %v2615_v57  ;;  %v2566_v22 = vmax.f32 %v2450_v31, 0.0 }
 0x494   : > { %v2456_v19 = vadd.f32 %v2455_v44, %v2119_v14  ;;  %v2567_v33 = vmax.f32 %v2452_v58, 0.0  ;;  %v2151_v58 = vpop.permute.xlu0 %2150 }
 0x495   : > { %v2568_v41 = vmax.f32 %v2454_v10, 0.0 }
 0x496   : > { %v2569_v11 = vmax.f32 %v2456_v19, 0.0 }
 0x497   : > { %v2617_v45 = vpack.c.bf16 %v2568_v41, %v2566_v22 }
 0x498   : > { %v2618_v18 = vpack.c.bf16 %v2569_v11, %v2567_v33  ;;  %v2459_v25 = vpop.f32.mrb[32].mxu1 }
 0x499   : > { %v2460_v56 = vadd.f32 %v2459_v25, %v2123_v37  ;;  %v2461_v46 = vpop.f32.mrb[33].mxu1 }
 0x49a   : > { %v2462_v29 = vadd.f32 %v2461_v46, %v2123_v37  ;;  %v2463_v13 = vpop.f32.mrb[34].mxu1  ;;  %2666 = vmatprep.subr.bf16.mxu0 %v2618_v18  ;;  %v2155_v18 = vpop.permute.xlu1 %2154 }
 0x49b   : > { %v2464_v7 = vadd.f32 %v2463_v13, %v2127_v53  ;;  %v2465_v43 = vpop.f32.mrb[35].mxu1  ;;  %2667 = vmatpush1.bf16.msra.mxu0 %v2617_v45  ;;  %v2570_v34 = vmax.f32 %v2460_v56, 0.0 }
 0x49c   : > { %v2466_v17 = vadd.f32 %v2465_v43, %v2127_v53  ;;  %v2571_v38 = vmax.f32 %v2462_v29, 0.0  ;;  %v2159_v29 = vpop.permute.xlu0 %2158 }
 0x49d   : > { %v2572_v55 = vmax.f32 %v2464_v7, 0.0 }
 0x49e   : > { %v2573_v32 = vmax.f32 %v2466_v17, 0.0 }
 0x49f   : > { %v2619_v21 = vpack.c.bf16 %v2572_v55, %v2570_v34 }
 0x4a0   : > { %v2620_v6 = vpack.c.bf16 %v2573_v32, %v2571_v38  ;;  %v2469_v9 = vpop.f32.mrb[36].mxu1 }
 0x4a1   : > { %v2470_v1 = vadd.f32 %v2469_v9, %v2131_v59  ;;  %v2471_v47 = vpop.f32.mrb[37].mxu1 }
 0x4a2   : > { %v2472_v51 = vadd.f32 %v2471_v47, %v2131_v59  ;;  %v2473_v23 = vpop.f32.mrb[38].mxu1  ;;  %2668 = vmatprep.subr.bf16.mxu0 %v2620_v6  ;;  %v2163_v6 = vpop.permute.xlu1 %2162 }
 0x4a3   : > { %v2474_v15 = vadd.f32 %v2473_v23, %v2135_v30  ;;  %v2475_v48 = vpop.f32.mrb[39].mxu1  ;;  %2669 = vmatpush1.bf16.msra.mxu0 %v2619_v21  ;;  %v2574_v16 = vmax.f32 %v2470_v1, 0.0 }
 0x4a4   : > { %v2476_v0 = vadd.f32 %v2475_v48, %v2135_v30  ;;  %v2575_v2 = vmax.f32 %v2472_v51, 0.0  ;;  %v2167_v51 = vpop.permute.xlu0 %2166 }
 0x4a5   : > { %v2576_v52 = vmax.f32 %v2474_v15, 0.0 }
 0x4a6   : > { %v2577_v36 = vmax.f32 %v2476_v0, 0.0 }
 0x4a7   : > { %v2621_v61 = vpack.c.bf16 %v2576_v52, %v2574_v16 }
 0x4a8   : > { %v2622_v4 = vpack.c.bf16 %v2577_v36, %v2575_v2  ;;  %v2479_v26 = vpop.f32.mrb[40].mxu1 }
 0x4a9   : > { %v2480_v24 = vadd.f32 %v2479_v26, %v2139_v8  ;;  %v2481_v5 = vpop.f32.mrb[41].mxu1 }
 0x4aa   : > { %v2482_v40 = vadd.f32 %v2481_v5, %v2139_v8  ;;  %v2483_v28 = vpop.f32.mrb[42].mxu1  ;;  %2670 = vmatprep.subr.bf16.mxu0 %v2622_v4  ;;  %v2171_v4 = vpop.permute.xlu1 %2170 }
 0x4ab   : > { %v2484_v12 = vadd.f32 %v2483_v28, %v2143_v54  ;;  %v2485_v27 = vpop.f32.mrb[43].mxu1  ;;  %2671 = vmatpush1.bf16.msra.mxu0 %v2621_v61  ;;  %v2578_v62 = vmax.f32 %v2480_v24, 0.0 }
 0x4ac   : > { %v2486_v20 = vadd.f32 %v2485_v27, %v2143_v54  ;;  %v2579_v50 = vmax.f32 %v2482_v40, 0.0  ;;  %v2175_v40 = vpop.permute.xlu0 %2174 }
 0x4ad   : > { %v2580_v3 = vmax.f32 %v2484_v12, 0.0 }
 0x4ae   : > { %v2581_v57 = vmax.f32 %v2486_v20, 0.0 }
 0x4af   : > { %v2623_v42 = vpack.c.bf16 %v2580_v3, %v2578_v62 }
 0x4b0   : > { %v2624_v35 = vpack.c.bf16 %v2581_v57, %v2579_v50  ;;  %v2489_v31 = vpop.f32.mrb[44].mxu1 }
 0x4b1   : > { %v2490_v39 = vadd.f32 %v2489_v31, %v2147_v60  ;;  %v2491_v14 = vpop.f32.mrb[45].mxu1 }
 0x4b2   : > { %v2492_v63 = vadd.f32 %v2491_v14, %v2147_v60  ;;  %v2493_v10 = vpop.f32.mrb[46].mxu1  ;;  %2672 = vmatprep.subr.bf16.mxu0 %v2624_v35  ;;  %v2179_v35 = vpop.permute.xlu1 %2178 }
 0x4b3   : > { %v2494_v44 = vadd.f32 %v2493_v10, %v2151_v58  ;;  %v2495_v19 = vpop.f32.mrb[47].mxu1  ;;  %2673 = vmatpush1.bf16.msra.mxu0 %v2623_v42  ;;  %v2582_v41 = vmax.f32 %v2490_v39, 0.0 }
 0x4b4   : > { %v2496_v22 = vadd.f32 %v2495_v19, %v2151_v58  ;;  %v2583_v11 = vmax.f32 %v2492_v63, 0.0  ;;  %v2183_v63 = vpop.permute.xlu0 %2182 }
 0x4b5   : > { %v2584_v33 = vmax.f32 %v2494_v44, 0.0 }
 0x4b6   : > { %v2585_v45 = vmax.f32 %v2496_v22, 0.0 }
 0x4b7   : > { %v2625_v37 = vpack.c.bf16 %v2584_v33, %v2582_v41 }
 0x4b8   : > { %v2626_v25 = vpack.c.bf16 %v2585_v45, %v2583_v11  ;;  %v2499_v56 = vpop.f32.mrb[48].mxu1 }
 0x4b9   : > { %v2500_v46 = vadd.f32 %v2499_v56, %v2155_v18  ;;  %v2501_v53 = vpop.f32.mrb[49].mxu1  ;;  %v2639_v56 = vpop.permute.xlu1 %2638 }
 0x4ba   : > { %v2502_v13 = vadd.f32 %v2501_v53, %v2155_v18  ;;  %v2503_v7 = vpop.f32.mrb[50].mxu1  ;;  %2674 = vmatprep.subr.bf16.mxu0 %v2626_v25 }
 0x4bb   : > { %v2504_v43 = vadd.f32 %v2503_v7, %v2159_v29  ;;  %v2505_v17 = vpop.f32.mrb[51].mxu1  ;;  %2675 = vmatpush1.bf16.msra.mxu0 %v2625_v37  ;;  %v2586_v55 = vmax.f32 %v2500_v46, 0.0 }
 0x4bc   : > { %v2506_v34 = vadd.f32 %v2505_v17, %v2159_v29  ;;  %v2587_v32 = vmax.f32 %v2502_v13, 0.0 }
 0x4bd   : > { %v2588_v38 = vmax.f32 %v2504_v43, 0.0 }
 0x4be   : > { %v2589_v21 = vmax.f32 %v2506_v34, 0.0 }
 0x4bf   : > { %v2627_v59 = vpack.c.bf16 %v2588_v38, %v2586_v55 }
 0x4c0   : > { %v2628_v9 = vpack.c.bf16 %v2589_v21, %v2587_v32  ;;  %v2509_v1 = vpop.f32.mrb[52].mxu1 }
 0x4c1   : > { %v2510_v47 = vadd.f32 %v2509_v1, %v2163_v6  ;;  %v2511_v30 = vpop.f32.mrb[53].mxu1 }
 0x4c2   : > { %v2512_v23 = vadd.f32 %v2511_v30, %v2163_v6  ;;  %v2513_v15 = vpop.f32.mrb[54].mxu1  ;;  %2676 = vmatprep.subr.bf16.mxu0 %v2628_v9 }
 0x4c3   : > { %v2514_v48 = vadd.f32 %v2513_v15, %v2167_v51  ;;  %v2515_v0 = vpop.f32.mrb[55].mxu1  ;;  %2677 = vmatpush1.bf16.msra.mxu0 %v2627_v59  ;;  %v2590_v52 = vmax.f32 %v2510_v47, 0.0 }
 0x4c4   : > { %v2516_v16 = vadd.f32 %v2515_v0, %v2167_v51  ;;  %v2591_v36 = vmax.f32 %v2512_v23, 0.0 }
 0x4c5   : > { %v2592_v2 = vmax.f32 %v2514_v48, 0.0 }
 0x4c6   : > { %v2593_v61 = vmax.f32 %v2516_v16, 0.0 }
 0x4c7   : > { %v2629_v8 = vpack.c.bf16 %v2592_v2, %v2590_v52 }
 0x4c8   : > { %v2630_v26 = vpack.c.bf16 %v2593_v61, %v2591_v36  ;;  %v2519_v24 = vpop.f32.mrb[56].mxu1 }
 0x4c9   : > { %v2520_v5 = vadd.f32 %v2519_v24, %v2171_v4  ;;  %v2521_v54 = vpop.f32.mrb[57].mxu1 }
 0x4ca   : > { %v2522_v28 = vadd.f32 %v2521_v54, %v2171_v4  ;;  %v2523_v12 = vpop.f32.mrb[58].mxu1  ;;  %2678 = vmatprep.subr.bf16.mxu0 %v2630_v26 }
 0x4cb   : > { %v2524_v27 = vadd.f32 %v2523_v12, %v2175_v40  ;;  %v2525_v20 = vpop.f32.mrb[59].mxu1  ;;  %2679 = vmatpush1.bf16.msra.mxu0 %v2629_v8  ;;  %v2594_v3 = vmax.f32 %v2520_v5, 0.0 }
 0x4cc   : > { %v2526_v62 = vadd.f32 %v2525_v20, %v2175_v40  ;;  %v2595_v57 = vmax.f32 %v2522_v28, 0.0 }
 0x4cd   : > { %v2596_v50 = vmax.f32 %v2524_v27, 0.0 }
 0x4ce   : > { %v2597_v42 = vmax.f32 %v2526_v62, 0.0 }
 0x4cf   : > { %v2631_v60 = vpack.c.bf16 %v2596_v50, %v2594_v3 }
 0x4d0   : > { %v2632_v31 = vpack.c.bf16 %v2597_v42, %v2595_v57  ;;  %v2529_v39 = vpop.f32.mrb[60].mxu1 }
 0x4d1   : > { %v2530_v14 = vadd.f32 %v2529_v39, %v2179_v35  ;;  %v2531_v58 = vpop.f32.mrb[61].mxu1 }
 0x4d2   : > { %v2532_v10 = vadd.f32 %v2531_v58, %v2179_v35  ;;  %v2533_v44 = vpop.f32.mrb[62].mxu1  ;;  %2680 = vmatprep.subr.bf16.mxu0 %v2632_v31 }
 0x4d3   : > { %v2534_v19 = vadd.f32 %v2533_v44, %v2183_v63  ;;  %v2535_v22 = vpop.f32.mrb[63].mxu1  ;;  %2681 = vmatpush1.bf16.msra.mxu0 %v2631_v60  ;;  %v2598_v33 = vmax.f32 %v2530_v14, 0.0 }
 0x4d4   : > { %v2536_v41 = vadd.f32 %v2535_v22, %v2183_v63  ;;  %v2599_v45 = vmax.f32 %v2532_v10, 0.0 }
 0x4d5   : > { %v2600_v11 = vmax.f32 %v2534_v19, 0.0 }
 0x4d6   : > { %v2601_v37 = vmax.f32 %v2536_v41, 0.0 }
 0x4d7   : > { %v2633_v18 = vpack.c.bf16 %v2600_v11, %v2598_v33 }
 0x4d8   : > { %v2634_v25 = vpack.c.bf16 %v2601_v37, %v2599_v45 }
 0x4da   : > { %2682 = vmatprep.subr.bf16.mxu0 %v2634_v25 }
 0x4db   : > { %2683 = vmatpush1.bf16.msra.mxu0 %v2633_v18 }
 0x4de   : > { %2685 = vmatmul.mubr.bf16.vlgmr.msra.gmra.mrb[64].mxu0 %v4495_v49 }
 0x5b1   : > { %v2686_v46 = vpop.f32.mrb[64].mxu0 }
 0x5b2   : > { %v2688_v53 = vpop.f32.mrb[65].mxu0  ;;  %v2687_v29 = vadd.f32 %v2686_v46, %v2639_v56 }
 0x5b3   : > { %v2690_v13 = vpop.f32.mrb[66].mxu0  ;;  %v2689_v7 = vadd.f32 %v2688_v53, %v2639_v56 }
 0x5b4   : > { %v2902_v43 = vmul.f32 -1.442695, %v2687_v29  ;;  %v2691_v17 = vpop.f32.mrb[67].mxu0 }
 0x5b5   : > { %v2903_v34 = vmul.f32 -1.442695, %v2689_v7 }
 0x5b6   : > { %3117 = vpow2.f32 %v2902_v43 }
 0x5b7   : > { %3119 = vpow2.f32 %v2903_v34 }
 0x5c0   : > { %v3118_v55 = vpop.eup %3117 }
 0x5c1   : > { %v3120_v38 = vpop.eup %3119  ;;  %v2699_v32 = vadd.f32 1.0, %v3118_v55 }
 0x5c2   : > { %v2700_v21 = vadd.f32 1.0, %v3120_v38 }
 0x5c3   : > { %3121 = vrcp.f32 %v2699_v32 }
 0x5c4   : > { %3123 = vrcp.f32 %v2700_v21 }
 0x5cd   : > { %v3122_v49 = vpop.eup %3121 }
 0x5ce   : > { %v3124_v59 = vpop.eup %3123 }
 0x5cf   : > { %v2707_v6 = vcombine.low %v3122_v49, %v3124_v59 }
 0x5d1   : > { %2709 = vst [vmem:[%s231_s30] sm:$0x77] %v2707_v6 }
 0x5d2   : > { %3194 = shalt.err (!%p3191_p7)
}
 0x5d3   : > { %s3195_s14 = scalar_lea.hbm %s4508_s9, 128  ;;  %s3199_s17 = scalar_lea.hbm %s4555_s5, 256 }
 0x5d4   : > { %p3196_p8 = scmp.ne.s32.totalorder %s4508_s9, %s3195_s14  ;;  %p3200_p1 = scmp.lt.u32.totalorder %s4508_s9, %s4555_s5 }
 0x5d5   : > { %p3201_p0 = scmp.lt.u32.totalorder %s3199_s17, %s3195_s14  ;;  %p3203_p6 = scmp.lt.u32.totalorder %s3195_s14, %s4508_s9 }
 0x5d6   : > { %p3197_p11 = pnand %p3196_p8, %p4662_p9 }
 0x5d7   : > { %p3202_p5 = por %p3201_p0, %p3200_p1 }
 0x5d8   : > { %p3198_p13 = pneg %p3197_p11 }
 0x5d9   : > { %p3204_p10 = por %p3203_p6, %p3202_p5 }
 0x5db   : > { %p3205_p12 = pnand %p3204_p10, %p3198_p13 }
 0x5dd   : > { %3208 = shalt.err (!%p3205_p12)
}
 0x5de   : > { %2914 = dma.vmem_to_hbm [thread:$0]  (%p4662_p9), %s4510_s6, 128, %s4508_s9, %s2711_s10  }
 0x5df PF: > { %p2926_p2 = scmp.ge.s32.totalorder %s3247_s21, 2  ;;  %s2737_s26 = sand.u32 1, %s3235_s18  }
 0x5e0   : > { %p4663_p3 = scmp.ne.s32.totalorder %s4595_s29, 0  ;;  %s2738_s30 = scalar_lea.sflag [#allocation4], %s2737_s26 }
 0x5e2   : > { %p2921_p4 = pnand %p2926_p2, %p4663_p3 }
 0x5e4   : > { %3230 = dma.done.wait (!%p2921_p4), %s2738_s30, 128  }
 0x5e5   : > { %3232 = vsyncadd (!%p2921_p4), %s2738_s30, 4294967168  ;;  %p16_p7 = scmp.ge.s32.totalorder %s3310_s24, 4   ;;  %s4664_s18 = smov %s3239_s19 }
 0x5e6   : > { %s4665_s19 = smov %s3243_s20  ;;  %s4666_s20 = smov %s3321_s27 }
 0x5e7   : > { %s4667_s21 = smov %s3310_s24  ;;  %18 = sbr.rel (!%p16_p7) target bundleno = 4 (0x4), region = 81 }
 0x5ee   :  { %2743 = vsyncpa [#allocation3], 1 }
 0x5ef   :  { %2745 = vsyncpa [#allocation3 + $0x1], 1 }
 0x5f0   :  { %2746 = vsyncpa [#allocation4], 1 }
 0x5f1   :  { %2748 = vsyncpa [#allocation4 + $0x1], 1 }

</bundles_post_ra>
